<compile_context>
chip_gen: v6e
topology: v6e:2x2x1
jax: 0.10.0
libtpu: 0.0.40
codegen_flags: <defaults>
</compile_context>

<pallas_src>
from functools import partial

import numpy as np
import jax
import jax.numpy as jnp
from jax.experimental import pallas as pl
from jax.experimental.pallas import tpu as pltpu


# Conv stack geometry (kernel, stride) — matches the PyTorch module.
_CONV1 = (8, 4)
_CONV2 = (4, 2)
_CONV3 = (3, 1)


# ----------------------------------------------------------------------------
# The single fused kernel: conv1 -> conv2 -> conv3 -> fc1 -> fc2.
# ----------------------------------------------------------------------------
def _net_kernel(p1_ref, w1_ref, b1_ref, w2_ref, b2_ref, w3_ref, b3_ref,
                wf1_ref, bf1_ref, wf2_ref, bf2_ref, out_ref, *, n_batch):
    f32, bf16 = jnp.float32, jnp.bfloat16

    # ---- conv1: one bf16 im2col GEMM. Rows of p1 are ordered
    #      ((conv2 tap q2), (conv2 output position k2), batch n); the 1/256
    #      input scale is already folded into w1.
    h1 = jnp.dot(p1_ref[...], w1_ref[...], preferred_element_type=f32)
    h1 = jnp.maximum(h1 + b1_ref[...], 0.0)                  # (16*9*N, 32) f32

    # ---- conv2: sum over its 16 kernel taps; each tap is a contiguous
    #      (9*N, 32) row group of h1 against a (32, 64) weight slab.
    m2 = 9 * n_batch
    acc2 = jnp.zeros((m2, 64), f32)
    for q in range(16):
        lhs = h1[q * m2:(q + 1) * m2, :].astype(bf16)
        rhs = w2_ref[pl.ds(q * 32, 32), :]
        acc2 = acc2 + jnp.dot(lhs, rhs, preferred_element_type=f32)
    h2 = jnp.maximum(acc2 + b2_ref[...], 0.0)                # (9*N, 64) f32

    # ---- conv3 (3x3 kernel over the 3x3 map -> 1x1 output): sum over its
    #      9 taps; h2 rows are ordered (spatial position k, batch n).
    acc3 = jnp.zeros((n_batch, 64), f32)
    for k in range(9):
        lhs = h2[k * n_batch:(k + 1) * n_batch, :].astype(bf16)
        rhs = w3_ref[pl.ds(k * 64, 64), :]
        acc3 = acc3 + jnp.dot(lhs, rhs, preferred_element_type=f32)
    h3 = jnp.maximum(acc3 + b3_ref[...], 0.0)                # (N, 64) f32

    # ---- fc1 (+ ReLU) and fc2 (logits), chained directly (conv output is
    #      1x1 spatial, so the PyTorch .view(N, -1) is a data no-op).
    h4 = jnp.dot(h3.astype(bf16), wf1_ref[...], preferred_element_type=f32)
    h4 = jnp.maximum(h4 + bf1_ref[...], 0.0)                 # (N, 512) f32

    out = jnp.dot(h4.astype(bf16), wf2_ref[...], preferred_element_type=f32)
    out_ref[...] = (out + bf2_ref[...]).astype(out_ref.dtype)


# ----------------------------------------------------------------------------
# XLA-level glue (runs once on the raw uint8 frame, outside the kernel):
# conv1 im2col with rows duplicated & grouped so the in-kernel conv2/conv3
# reductions are contiguous row-group matmuls.
# ----------------------------------------------------------------------------
def _conv1_patches_grouped(x_f32):
    """x_f32: (N, C, H, W) float32.

    Returns (p1, oh2, ow2) where p1 has shape (16 * oh2*ow2 * N, 8*8*C) and
    row ((di2*4 + dj2) * (oh2*ow2) + oi2*ow2 + oj2) * N + n holds the
    (kh, kw, c)-flattened conv1 input patch for conv1 output position
    (s2*oi2 + di2, s2*oj2 + dj2) of sample n.
    """
    n, c, h, w = x_f32.shape
    k1, s1 = _CONV1
    k2, s2 = _CONV2
    oh1 = (h - k1) // s1 + 1
    ow1 = (w - k1) // s1 + 1
    oh2 = (oh1 - k2) // s2 + 1
    ow2 = (ow1 - k2) // s2 + 1

    xh = jnp.transpose(x_f32, (0, 2, 3, 1))            # NHWC, channels on lanes
    cols = []
    for di in range(k1):
        for dj in range(k1):
            cols.append(xh[:, di:di + s1 * (oh1 - 1) + 1:s1,
                            dj:dj + s1 * (ow1 - 1) + 1:s1, :])
    # (N, oh1, ow1, k1*k1*C); columns in (kh, kw, c) order.
    patches = jnp.concatenate(cols, axis=-1)

    slabs = []
    for di2 in range(k2):
        for dj2 in range(k2):
            slabs.append(patches[:, di2:di2 + s2 * (oh2 - 1) + 1:s2,
                                  dj2:dj2 + s2 * (ow2 - 1) + 1:s2, :])
    grouped = jnp.stack(slabs, axis=0)                 # (16, N, oh2, ow2, K1)
    grouped = jnp.transpose(grouped, (0, 2, 3, 1, 4))  # (16, oh2, ow2, N, K1)
    p1 = grouped.reshape(k2 * k2 * oh2 * ow2 * n, k1 * k1 * c)
    return p1, oh2, ow2


# ----------------------------------------------------------------------------
# Parameters. Conv weights are stored in GEMM form (KH*KW*C_in, C_out) with
# rows flattened in (kh, kw, c_in) order.
# ----------------------------------------------------------------------------
def _init_layer(key, fan_in, fan_out):
    bound = 1.0 / np.sqrt(fan_in)
    kw_, kb_ = jax.random.split(key)
    w = jax.random.uniform(kw_, (fan_in, fan_out), jnp.float32, -bound, bound)
    b = jax.random.uniform(kb_, (fan_out,), jnp.float32, -bound, bound)
    return w, b


def init_params(key, in_channels, conv_out_size, n_actions):
    keys = jax.random.split(key, 5)
    params = {}
    params["c1_w"], params["c1_b"] = _init_layer(keys[0], 8 * 8 * in_channels, 32)
    params["c2_w"], params["c2_b"] = _init_layer(keys[1], 4 * 4 * 32, 64)
    params["c3_w"], params["c3_b"] = _init_layer(keys[2], 3 * 3 * 64, 64)
    params["fc1_w"], params["fc1_b"] = _init_layer(keys[3], conv_out_size, 512)
    params["fc2_w"], params["fc2_b"] = _init_layer(keys[4], 512, n_actions)
    return params


def prepare_kernel_params(params):
    """Fold 1/256 into conv1 weights, cast weights to bf16, biases to (1, N) f32."""
    kp = {}
    kp["c1_w"] = (params["c1_w"] * (1.0 / 256.0)).astype(jnp.bfloat16)
    for name in ("c2_w", "c3_w", "fc1_w", "fc2_w"):
        kp[name] = params[name].astype(jnp.bfloat16)
    for name in ("c1_b", "c2_b", "c3_b", "fc1_b", "fc2_b"):
        kp[name] = params[name].reshape(1, -1).astype(jnp.float32)
    return kp


# ----------------------------------------------------------------------------
# Forward pass: matches Net.forward (x/256 -> conv stack -> flatten -> fc).
# ----------------------------------------------------------------------------
@jax.jit
def net_forward(kernel_params, x):
    kp = kernel_params
    n = x.shape[0]
    n_actions = kp["fc2_w"].shape[1]

    p1, oh2, ow2 = _conv1_patches_grouped(x.astype(jnp.float32))
    # Fused kernel assumes conv2 output is 3x3 (=> conv3 output is 1x1).
    assert oh2 == 3 and ow2 == 3, "fused kernel requires 36x36 input frames"
    p1 = p1.astype(jnp.bfloat16)

    operands = (p1, kp["c1_w"], kp["c1_b"], kp["c2_w"], kp["c2_b"],
                kp["c3_w"], kp["c3_b"], kp["fc1_w"], kp["fc1_b"],
                kp["fc2_w"], kp["fc2_b"])
    in_specs = [pl.BlockSpec(op.shape, lambda i: (0, 0)) for op in operands]

    return pl.pallas_call(
        partial(_net_kernel, n_batch=n),
        out_shape=jax.ShapeDtypeStruct((n, n_actions), jnp.float32),
        grid=(1,),
        in_specs=in_specs,
        out_specs=pl.BlockSpec((n, n_actions), lambda i: (0, 0)),
        compiler_params=pltpu.CompilerParams(
            dimension_semantics=("arbitrary",)),
    )(*operands)


# ----------------------------------------------------------------------------
# Pure-JAX f32 reference (faithful to the PyTorch module) for correctness.
# ----------------------------------------------------------------------------
def reference_forward(params, x):
    fx = x.astype(jnp.float32) / 256.0

    def conv(h, w_gemm, b, k, stride, out_c):
        in_c = h.shape[1]
        # (kh*kw*c_in, out) rows in (kh, kw, c) order -> OIHW
        w = w_gemm.T.reshape(out_c, k, k, in_c).transpose(0, 3, 1, 2)
        y = jax.lax.conv_general_dilated(
            h, w, (stride, stride), "VALID",
            dimension_numbers=("NCHW", "OIHW", "NCHW"))
        return jax.nn.relu(y + b.reshape(1, -1, 1, 1))

    h = conv(fx, params["c1_w"], params["c1_b"], 8, 4, 32)
    h = conv(h, params["c2_w"], params["c2_b"], 4, 2, 64)
    h = conv(h, params["c3_w"], params["c3_b"], 3, 1, 64)
    flat = h.reshape(x.shape[0], -1)
    h = jax.nn.relu(flat @ params["fc1_w"] + params["fc1_b"])
    return h @ params["fc2_w"] + params["fc2_b"]


if __name__ == "__main__":
    # 36 is the smallest spatial size the conv stack (8/4 -> 4/2 -> 3/1)
    # supports; it yields a 64ch x 1 x 1 conv output (conv_out_size = 64).
    batch, channels, spatial, n_actions = 2, 4, 36, 4
    conv_out_size = 64 * 1 * 1

    key = jax.random.PRNGKey(0)
    k_params, k_x = jax.random.split(key)
    params = init_params(k_params, channels, conv_out_size, n_actions)
    kparams = prepare_kernel_params(params)
    x = jax.random.randint(k_x, (batch, channels, spatial, spatial), 0, 256,
                           dtype=jnp.int32).astype(jnp.uint8)

    out = net_forward(kparams, x)
    jax.block_until_ready(out)

    ref = reference_forward(params, x)
    # bf16 GEMM inputs (f32 accumulation) => loosened tolerance vs f32 ref.
    np.testing.assert_allclose(np.asarray(out), np.asarray(ref),
                               rtol=5e-2, atol=2e-2)
    assert out.shape == (batch, n_actions)
    print("KERNEL_OK")
</pallas_src>

<mosaic_0001>
module attributes {stable_mosaic.version = 11 : i64} {
  func.func @_net_kernel(%arg0: i32, %arg1: memref<288x256xbf16, #tpu.memory_space<vmem>>, %arg2: memref<256x32xbf16, #tpu.memory_space<vmem>>, %arg3: memref<1x32xf32, #tpu.memory_space<vmem>>, %arg4: memref<512x64xbf16, #tpu.memory_space<vmem>>, %arg5: memref<1x64xf32, #tpu.memory_space<vmem>>, %arg6: memref<576x64xbf16, #tpu.memory_space<vmem>>, %arg7: memref<1x64xf32, #tpu.memory_space<vmem>>, %arg8: memref<64x512xbf16, #tpu.memory_space<vmem>>, %arg9: memref<1x512xf32, #tpu.memory_space<vmem>>, %arg10: memref<512x4xbf16, #tpu.memory_space<vmem>>, %arg11: memref<1x4xf32, #tpu.memory_space<vmem>>, %arg12: memref<2x4xf32, #tpu.memory_space<vmem>>) attributes {dimension_semantics = [#tpu.dimension_semantics<arbitrary>], iteration_bounds = array<i64: 1>, scalar_prefetch = 0 : i64, scratch_operands = 0 : i64, tpu.core_type = #tpu.core_type<tc>, window_params = [{pipeline_mode = #tpu.pipeline_mode<synchronous>, transform_indices = @transform_0, window_bounds = array<i64: 288, 256>}, {pipeline_mode = #tpu.pipeline_mode<synchronous>, transform_indices = @transform_1, window_bounds = array<i64: 256, 32>}, {pipeline_mode = #tpu.pipeline_mode<synchronous>, transform_indices = @transform_2, window_bounds = array<i64: 1, 32>}, {pipeline_mode = #tpu.pipeline_mode<synchronous>, transform_indices = @transform_3, window_bounds = array<i64: 512, 64>}, {pipeline_mode = #tpu.pipeline_mode<synchronous>, transform_indices = @transform_4, window_bounds = array<i64: 1, 64>}, {pipeline_mode = #tpu.pipeline_mode<synchronous>, transform_indices = @transform_5, window_bounds = array<i64: 576, 64>}, {pipeline_mode = #tpu.pipeline_mode<synchronous>, transform_indices = @transform_6, window_bounds = array<i64: 1, 64>}, {pipeline_mode = #tpu.pipeline_mode<synchronous>, transform_indices = @transform_7, window_bounds = array<i64: 64, 512>}, {pipeline_mode = #tpu.pipeline_mode<synchronous>, transform_indices = @transform_8, window_bounds = array<i64: 1, 512>}, {pipeline_mode = #tpu.pipeline_mode<synchronous>, transform_indices = @transform_9, window_bounds = array<i64: 512, 4>}, {pipeline_mode = #tpu.pipeline_mode<synchronous>, transform_indices = @transform_10, window_bounds = array<i64: 1, 4>}, {pipeline_mode = #tpu.pipeline_mode<synchronous>, transform_indices = @transform_11, window_bounds = array<i64: 2, 4>}]} {
    %c0 = arith.constant 0 : index
    %c0_0 = arith.constant 0 : index
    %0 = vector.load %arg1[%c0, %c0_0] : memref<288x256xbf16, #tpu.memory_space<vmem>>, vector<288x256xbf16>
    %c0_1 = arith.constant 0 : index
    %c0_2 = arith.constant 0 : index
    %1 = vector.load %arg2[%c0_1, %c0_2] : memref<256x32xbf16, #tpu.memory_space<vmem>>, vector<256x32xbf16>
    %cst = arith.constant dense<0.000000e+00> : vector<288x32xf32>
    %2 = tpu.matmul %0, %1, %cst {dimension_numbers = #tpu.dot_dimension_numbers<[1], [0], [0], [1], [0, 0, 1, 1], [], []>} : vector<288x256xbf16>, vector<256x32xbf16>, vector<288x32xf32> -> vector<288x32xf32>
    %c0_3 = arith.constant 0 : index
    %c0_4 = arith.constant 0 : index
    %3 = vector.load %arg3[%c0_3, %c0_4] : memref<1x32xf32, #tpu.memory_space<vmem>>, vector<1x32xf32>
    %4 = vector.broadcast %3 : vector<1x32xf32> to vector<288x32xf32>
    %5 = arith.addf %2, %4 : vector<288x32xf32>
    %cst_5 = arith.constant 0.000000e+00 : f32
    %6 = vector.broadcast %cst_5 : f32 to vector<288x32xf32>
    %7 = arith.maximumf %5, %6 : vector<288x32xf32>
    %cst_6 = arith.constant 0.000000e+00 : f32
    %8 = vector.broadcast %cst_6 : f32 to vector<18x64xf32>
    %9 = vector.extract_strided_slice %7 {offsets = [0, 0], sizes = [18, 32], strides = [1, 1]} : vector<288x32xf32> to vector<18x32xf32>
    %10 = arith.truncf %9 : vector<18x32xf32> to vector<18x32xbf16>
    %c0_7 = arith.constant 0 : index
    %c0_8 = arith.constant 0 : index
    %11 = vector.load %arg4[%c0_7, %c0_8] : memref<512x64xbf16, #tpu.memory_space<vmem>>, vector<32x64xbf16>
    %cst_9 = arith.constant dense<0.000000e+00> : vector<18x64xf32>
    %12 = tpu.matmul %10, %11, %cst_9 {dimension_numbers = #tpu.dot_dimension_numbers<[1], [0], [0], [1], [0, 0, 1, 1], [], []>} : vector<18x32xbf16>, vector<32x64xbf16>, vector<18x64xf32> -> vector<18x64xf32>
    %13 = arith.addf %8, %12 : vector<18x64xf32>
    %14 = vector.extract_strided_slice %7 {offsets = [18, 0], sizes = [18, 32], strides = [1, 1]} : vector<288x32xf32> to vector<18x32xf32>
    %15 = arith.truncf %14 : vector<18x32xf32> to vector<18x32xbf16>
    %c32 = arith.constant 32 : index
    %c0_10 = arith.constant 0 : index
    %16 = vector.load %arg4[%c32, %c0_10] : memref<512x64xbf16, #tpu.memory_space<vmem>>, vector<32x64xbf16>
    %cst_11 = arith.constant dense<0.000000e+00> : vector<18x64xf32>
    %17 = tpu.matmul %15, %16, %cst_11 {dimension_numbers = #tpu.dot_dimension_numbers<[1], [0], [0], [1], [0, 0, 1, 1], [], []>} : vector<18x32xbf16>, vector<32x64xbf16>, vector<18x64xf32> -> vector<18x64xf32>
    %18 = arith.addf %13, %17 : vector<18x64xf32>
    %19 = vector.extract_strided_slice %7 {offsets = [36, 0], sizes = [18, 32], strides = [1, 1]} : vector<288x32xf32> to vector<18x32xf32>
    %20 = arith.truncf %19 : vector<18x32xf32> to vector<18x32xbf16>
    %c64 = arith.constant 64 : index
    %c0_12 = arith.constant 0 : index
    %21 = vector.load %arg4[%c64, %c0_12] : memref<512x64xbf16, #tpu.memory_space<vmem>>, vector<32x64xbf16>
    %cst_13 = arith.constant dense<0.000000e+00> : vector<18x64xf32>
    %22 = tpu.matmul %20, %21, %cst_13 {dimension_numbers = #tpu.dot_dimension_numbers<[1], [0], [0], [1], [0, 0, 1, 1], [], []>} : vector<18x32xbf16>, vector<32x64xbf16>, vector<18x64xf32> -> vector<18x64xf32>
    %23 = arith.addf %18, %22 : vector<18x64xf32>
    %24 = vector.extract_strided_slice %7 {offsets = [54, 0], sizes = [18, 32], strides = [1, 1]} : vector<288x32xf32> to vector<18x32xf32>
    %25 = arith.truncf %24 : vector<18x32xf32> to vector<18x32xbf16>
    %c96 = arith.constant 96 : index
    %c0_14 = arith.constant 0 : index
    %26 = vector.load %arg4[%c96, %c0_14] : memref<512x64xbf16, #tpu.memory_space<vmem>>, vector<32x64xbf16>
    %cst_15 = arith.constant dense<0.000000e+00> : vector<18x64xf32>
    %27 = tpu.matmul %25, %26, %cst_15 {dimension_numbers = #tpu.dot_dimension_numbers<[1], [0], [0], [1], [0, 0, 1, 1], [], []>} : vector<18x32xbf16>, vector<32x64xbf16>, vector<18x64xf32> -> vector<18x64xf32>
    %28 = arith.addf %23, %27 : vector<18x64xf32>
    %29 = vector.extract_strided_slice %7 {offsets = [72, 0], sizes = [18, 32], strides = [1, 1]} : vector<288x32xf32> to vector<18x32xf32>
    %30 = arith.truncf %29 : vector<18x32xf32> to vector<18x32xbf16>
    %c128 = arith.constant 128 : index
    %c0_16 = arith.constant 0 : index
    %31 = vector.load %arg4[%c128, %c0_16] : memref<512x64xbf16, #tpu.memory_space<vmem>>, vector<32x64xbf16>
    %cst_17 = arith.constant dense<0.000000e+00> : vector<18x64xf32>
    %32 = tpu.matmul %30, %31, %cst_17 {dimension_numbers = #tpu.dot_dimension_numbers<[1], [0], [0], [1], [0, 0, 1, 1], [], []>} : vector<18x32xbf16>, vector<32x64xbf16>, vector<18x64xf32> -> vector<18x64xf32>
    %33 = arith.addf %28, %32 : vector<18x64xf32>
    %34 = vector.extract_strided_slice %7 {offsets = [90, 0], sizes = [18, 32], strides = [1, 1]} : vector<288x32xf32> to vector<18x32xf32>
    %35 = arith.truncf %34 : vector<18x32xf32> to vector<18x32xbf16>
    %c160 = arith.constant 160 : index
    %c0_18 = arith.constant 0 : index
    %36 = vector.load %arg4[%c160, %c0_18] : memref<512x64xbf16, #tpu.memory_space<vmem>>, vector<32x64xbf16>
    %cst_19 = arith.constant dense<0.000000e+00> : vector<18x64xf32>
    %37 = tpu.matmul %35, %36, %cst_19 {dimension_numbers = #tpu.dot_dimension_numbers<[1], [0], [0], [1], [0, 0, 1, 1], [], []>} : vector<18x32xbf16>, vector<32x64xbf16>, vector<18x64xf32> -> vector<18x64xf32>
    %38 = arith.addf %33, %37 : vector<18x64xf32>
    %39 = vector.extract_strided_slice %7 {offsets = [108, 0], sizes = [18, 32], strides = [1, 1]} : vector<288x32xf32> to vector<18x32xf32>
    %40 = arith.truncf %39 : vector<18x32xf32> to vector<18x32xbf16>
    %c192 = arith.constant 192 : index
    %c0_20 = arith.constant 0 : index
    %41 = vector.load %arg4[%c192, %c0_20] : memref<512x64xbf16, #tpu.memory_space<vmem>>, vector<32x64xbf16>
    %cst_21 = arith.constant dense<0.000000e+00> : vector<18x64xf32>
    %42 = tpu.matmul %40, %41, %cst_21 {dimension_numbers = #tpu.dot_dimension_numbers<[1], [0], [0], [1], [0, 0, 1, 1], [], []>} : vector<18x32xbf16>, vector<32x64xbf16>, vector<18x64xf32> -> vector<18x64xf32>
    %43 = arith.addf %38, %42 : vector<18x64xf32>
    %44 = vector.extract_strided_slice %7 {offsets = [126, 0], sizes = [18, 32], strides = [1, 1]} : vector<288x32xf32> to vector<18x32xf32>
    %45 = arith.truncf %44 : vector<18x32xf32> to vector<18x32xbf16>
    %c224 = arith.constant 224 : index
    %c0_22 = arith.constant 0 : index
    %46 = vector.load %arg4[%c224, %c0_22] : memref<512x64xbf16, #tpu.memory_space<vmem>>, vector<32x64xbf16>
    %cst_23 = arith.constant dense<0.000000e+00> : vector<18x64xf32>
    %47 = tpu.matmul %45, %46, %cst_23 {dimension_numbers = #tpu.dot_dimension_numbers<[1], [0], [0], [1], [0, 0, 1, 1], [], []>} : vector<18x32xbf16>, vector<32x64xbf16>, vector<18x64xf32> -> vector<18x64xf32>
    %48 = arith.addf %43, %47 : vector<18x64xf32>
    %49 = vector.extract_strided_slice %7 {offsets = [144, 0], sizes = [18, 32], strides = [1, 1]} : vector<288x32xf32> to vector<18x32xf32>
    %50 = arith.truncf %49 : vector<18x32xf32> to vector<18x32xbf16>
    %c256 = arith.constant 256 : index
    %c0_24 = arith.constant 0 : index
    %51 = vector.load %arg4[%c256, %c0_24] : memref<512x64xbf16, #tpu.memory_space<vmem>>, vector<32x64xbf16>
    %cst_25 = arith.constant dense<0.000000e+00> : vector<18x64xf32>
    %52 = tpu.matmul %50, %51, %cst_25 {dimension_numbers = #tpu.dot_dimension_numbers<[1], [0], [0], [1], [0, 0, 1, 1], [], []>} : vector<18x32xbf16>, vector<32x64xbf16>, vector<18x64xf32> -> vector<18x64xf32>
    %53 = arith.addf %48, %52 : vector<18x64xf32>
    %54 = vector.extract_strided_slice %7 {offsets = [162, 0], sizes = [18, 32], strides = [1, 1]} : vector<288x32xf32> to vector<18x32xf32>
    %55 = arith.truncf %54 : vector<18x32xf32> to vector<18x32xbf16>
    %c288 = arith.constant 288 : index
    %c0_26 = arith.constant 0 : index
    %56 = vector.load %arg4[%c288, %c0_26] : memref<512x64xbf16, #tpu.memory_space<vmem>>, vector<32x64xbf16>
    %cst_27 = arith.constant dense<0.000000e+00> : vector<18x64xf32>
    %57 = tpu.matmul %55, %56, %cst_27 {dimension_numbers = #tpu.dot_dimension_numbers<[1], [0], [0], [1], [0, 0, 1, 1], [], []>} : vector<18x32xbf16>, vector<32x64xbf16>, vector<18x64xf32> -> vector<18x64xf32>
    %58 = arith.addf %53, %57 : vector<18x64xf32>
    %59 = vector.extract_strided_slice %7 {offsets = [180, 0], sizes = [18, 32], strides = [1, 1]} : vector<288x32xf32> to vector<18x32xf32>
    %60 = arith.truncf %59 : vector<18x32xf32> to vector<18x32xbf16>
    %c320 = arith.constant 320 : index
    %c0_28 = arith.constant 0 : index
    %61 = vector.load %arg4[%c320, %c0_28] : memref<512x64xbf16, #tpu.memory_space<vmem>>, vector<32x64xbf16>
    %cst_29 = arith.constant dense<0.000000e+00> : vector<18x64xf32>
    %62 = tpu.matmul %60, %61, %cst_29 {dimension_numbers = #tpu.dot_dimension_numbers<[1], [0], [0], [1], [0, 0, 1, 1], [], []>} : vector<18x32xbf16>, vector<32x64xbf16>, vector<18x64xf32> -> vector<18x64xf32>
    %63 = arith.addf %58, %62 : vector<18x64xf32>
    %64 = vector.extract_strided_slice %7 {offsets = [198, 0], sizes = [18, 32], strides = [1, 1]} : vector<288x32xf32> to vector<18x32xf32>
    %65 = arith.truncf %64 : vector<18x32xf32> to vector<18x32xbf16>
    %c352 = arith.constant 352 : index
    %c0_30 = arith.constant 0 : index
    %66 = vector.load %arg4[%c352, %c0_30] : memref<512x64xbf16, #tpu.memory_space<vmem>>, vector<32x64xbf16>
    %cst_31 = arith.constant dense<0.000000e+00> : vector<18x64xf32>
    %67 = tpu.matmul %65, %66, %cst_31 {dimension_numbers = #tpu.dot_dimension_numbers<[1], [0], [0], [1], [0, 0, 1, 1], [], []>} : vector<18x32xbf16>, vector<32x64xbf16>, vector<18x64xf32> -> vector<18x64xf32>
    %68 = arith.addf %63, %67 : vector<18x64xf32>
    %69 = vector.extract_strided_slice %7 {offsets = [216, 0], sizes = [18, 32], strides = [1, 1]} : vector<288x32xf32> to vector<18x32xf32>
    %70 = arith.truncf %69 : vector<18x32xf32> to vector<18x32xbf16>
    %c384 = arith.constant 384 : index
    %c0_32 = arith.constant 0 : index
    %71 = vector.load %arg4[%c384, %c0_32] : memref<512x64xbf16, #tpu.memory_space<vmem>>, vector<32x64xbf16>
    %cst_33 = arith.constant dense<0.000000e+00> : vector<18x64xf32>
    %72 = tpu.matmul %70, %71, %cst_33 {dimension_numbers = #tpu.dot_dimension_numbers<[1], [0], [0], [1], [0, 0, 1, 1], [], []>} : vector<18x32xbf16>, vector<32x64xbf16>, vector<18x64xf32> -> vector<18x64xf32>
    %73 = arith.addf %68, %72 : vector<18x64xf32>
    %74 = vector.extract_strided_slice %7 {offsets = [234, 0], sizes = [18, 32], strides = [1, 1]} : vector<288x32xf32> to vector<18x32xf32>
    %75 = arith.truncf %74 : vector<18x32xf32> to vector<18x32xbf16>
    %c416 = arith.constant 416 : index
    %c0_34 = arith.constant 0 : index
    %76 = vector.load %arg4[%c416, %c0_34] : memref<512x64xbf16, #tpu.memory_space<vmem>>, vector<32x64xbf16>
    %cst_35 = arith.constant dense<0.000000e+00> : vector<18x64xf32>
    %77 = tpu.matmul %75, %76, %cst_35 {dimension_numbers = #tpu.dot_dimension_numbers<[1], [0], [0], [1], [0, 0, 1, 1], [], []>} : vector<18x32xbf16>, vector<32x64xbf16>, vector<18x64xf32> -> vector<18x64xf32>
    %78 = arith.addf %73, %77 : vector<18x64xf32>
    %79 = vector.extract_strided_slice %7 {offsets = [252, 0], sizes = [18, 32], strides = [1, 1]} : vector<288x32xf32> to vector<18x32xf32>
    %80 = arith.truncf %79 : vector<18x32xf32> to vector<18x32xbf16>
    %c448 = arith.constant 448 : index
    %c0_36 = arith.constant 0 : index
    %81 = vector.load %arg4[%c448, %c0_36] : memref<512x64xbf16, #tpu.memory_space<vmem>>, vector<32x64xbf16>
    %cst_37 = arith.constant dense<0.000000e+00> : vector<18x64xf32>
    %82 = tpu.matmul %80, %81, %cst_37 {dimension_numbers = #tpu.dot_dimension_numbers<[1], [0], [0], [1], [0, 0, 1, 1], [], []>} : vector<18x32xbf16>, vector<32x64xbf16>, vector<18x64xf32> -> vector<18x64xf32>
    %83 = arith.addf %78, %82 : vector<18x64xf32>
    %84 = vector.extract_strided_slice %7 {offsets = [270, 0], sizes = [18, 32], strides = [1, 1]} : vector<288x32xf32> to vector<18x32xf32>
    %85 = arith.truncf %84 : vector<18x32xf32> to vector<18x32xbf16>
    %c480 = arith.constant 480 : index
    %c0_38 = arith.constant 0 : index
    %86 = vector.load %arg4[%c480, %c0_38] : memref<512x64xbf16, #tpu.memory_space<vmem>>, vector<32x64xbf16>
    %cst_39 = arith.constant dense<0.000000e+00> : vector<18x64xf32>
    %87 = tpu.matmul %85, %86, %cst_39 {dimension_numbers = #tpu.dot_dimension_numbers<[1], [0], [0], [1], [0, 0, 1, 1], [], []>} : vector<18x32xbf16>, vector<32x64xbf16>, vector<18x64xf32> -> vector<18x64xf32>
    %88 = arith.addf %83, %87 : vector<18x64xf32>
    %c0_40 = arith.constant 0 : index
    %c0_41 = arith.constant 0 : index
    %89 = vector.load %arg5[%c0_40, %c0_41] : memref<1x64xf32, #tpu.memory_space<vmem>>, vector<1x64xf32>
    %90 = vector.broadcast %89 : vector<1x64xf32> to vector<18x64xf32>
    %91 = arith.addf %88, %90 : vector<18x64xf32>
    %cst_42 = arith.constant 0.000000e+00 : f32
    %92 = vector.broadcast %cst_42 : f32 to vector<18x64xf32>
    %93 = arith.maximumf %91, %92 : vector<18x64xf32>
    %cst_43 = arith.constant 0.000000e+00 : f32
    %94 = vector.broadcast %cst_43 : f32 to vector<2x64xf32>
    %95 = vector.extract_strided_slice %93 {offsets = [0, 0], sizes = [2, 64], strides = [1, 1]} : vector<18x64xf32> to vector<2x64xf32>
    %96 = arith.truncf %95 : vector<2x64xf32> to vector<2x64xbf16>
    %c0_44 = arith.constant 0 : index
    %c0_45 = arith.constant 0 : index
    %97 = vector.load %arg6[%c0_44, %c0_45] : memref<576x64xbf16, #tpu.memory_space<vmem>>, vector<64x64xbf16>
    %cst_46 = arith.constant dense<0.000000e+00> : vector<2x64xf32>
    %98 = tpu.matmul %96, %97, %cst_46 {dimension_numbers = #tpu.dot_dimension_numbers<[1], [0], [0], [1], [0, 0, 1, 1], [], []>} : vector<2x64xbf16>, vector<64x64xbf16>, vector<2x64xf32> -> vector<2x64xf32>
    %99 = arith.addf %94, %98 : vector<2x64xf32>
    %100 = vector.extract_strided_slice %93 {offsets = [2, 0], sizes = [2, 64], strides = [1, 1]} : vector<18x64xf32> to vector<2x64xf32>
    %101 = arith.truncf %100 : vector<2x64xf32> to vector<2x64xbf16>
    %c64_47 = arith.constant 64 : index
    %c0_48 = arith.constant 0 : index
    %102 = vector.load %arg6[%c64_47, %c0_48] : memref<576x64xbf16, #tpu.memory_space<vmem>>, vector<64x64xbf16>
    %cst_49 = arith.constant dense<0.000000e+00> : vector<2x64xf32>
    %103 = tpu.matmul %101, %102, %cst_49 {dimension_numbers = #tpu.dot_dimension_numbers<[1], [0], [0], [1], [0, 0, 1, 1], [], []>} : vector<2x64xbf16>, vector<64x64xbf16>, vector<2x64xf32> -> vector<2x64xf32>
    %104 = arith.addf %99, %103 : vector<2x64xf32>
    %105 = vector.extract_strided_slice %93 {offsets = [4, 0], sizes = [2, 64], strides = [1, 1]} : vector<18x64xf32> to vector<2x64xf32>
    %106 = arith.truncf %105 : vector<2x64xf32> to vector<2x64xbf16>
    %c128_50 = arith.constant 128 : index
    %c0_51 = arith.constant 0 : index
    %107 = vector.load %arg6[%c128_50, %c0_51] : memref<576x64xbf16, #tpu.memory_space<vmem>>, vector<64x64xbf16>
    %cst_52 = arith.constant dense<0.000000e+00> : vector<2x64xf32>
    %108 = tpu.matmul %106, %107, %cst_52 {dimension_numbers = #tpu.dot_dimension_numbers<[1], [0], [0], [1], [0, 0, 1, 1], [], []>} : vector<2x64xbf16>, vector<64x64xbf16>, vector<2x64xf32> -> vector<2x64xf32>
    %109 = arith.addf %104, %108 : vector<2x64xf32>
    %110 = vector.extract_strided_slice %93 {offsets = [6, 0], sizes = [2, 64], strides = [1, 1]} : vector<18x64xf32> to vector<2x64xf32>
    %111 = arith.truncf %110 : vector<2x64xf32> to vector<2x64xbf16>
    %c192_53 = arith.constant 192 : index
    %c0_54 = arith.constant 0 : index
    %112 = vector.load %arg6[%c192_53, %c0_54] : memref<576x64xbf16, #tpu.memory_space<vmem>>, vector<64x64xbf16>
    %cst_55 = arith.constant dense<0.000000e+00> : vector<2x64xf32>
    %113 = tpu.matmul %111, %112, %cst_55 {dimension_numbers = #tpu.dot_dimension_numbers<[1], [0], [0], [1], [0, 0, 1, 1], [], []>} : vector<2x64xbf16>, vector<64x64xbf16>, vector<2x64xf32> -> vector<2x64xf32>
    %114 = arith.addf %109, %113 : vector<2x64xf32>
    %115 = vector.extract_strided_slice %93 {offsets = [8, 0], sizes = [2, 64], strides = [1, 1]} : vector<18x64xf32> to vector<2x64xf32>
    %116 = arith.truncf %115 : vector<2x64xf32> to vector<2x64xbf16>
    %c256_56 = arith.constant 256 : index
    %c0_57 = arith.constant 0 : index
    %117 = vector.load %arg6[%c256_56, %c0_57] : memref<576x64xbf16, #tpu.memory_space<vmem>>, vector<64x64xbf16>
    %cst_58 = arith.constant dense<0.000000e+00> : vector<2x64xf32>
    %118 = tpu.matmul %116, %117, %cst_58 {dimension_numbers = #tpu.dot_dimension_numbers<[1], [0], [0], [1], [0, 0, 1, 1], [], []>} : vector<2x64xbf16>, vector<64x64xbf16>, vector<2x64xf32> -> vector<2x64xf32>
    %119 = arith.addf %114, %118 : vector<2x64xf32>
    %120 = vector.extract_strided_slice %93 {offsets = [10, 0], sizes = [2, 64], strides = [1, 1]} : vector<18x64xf32> to vector<2x64xf32>
    %121 = arith.truncf %120 : vector<2x64xf32> to vector<2x64xbf16>
    %c320_59 = arith.constant 320 : index
    %c0_60 = arith.constant 0 : index
    %122 = vector.load %arg6[%c320_59, %c0_60] : memref<576x64xbf16, #tpu.memory_space<vmem>>, vector<64x64xbf16>
    %cst_61 = arith.constant dense<0.000000e+00> : vector<2x64xf32>
    %123 = tpu.matmul %121, %122, %cst_61 {dimension_numbers = #tpu.dot_dimension_numbers<[1], [0], [0], [1], [0, 0, 1, 1], [], []>} : vector<2x64xbf16>, vector<64x64xbf16>, vector<2x64xf32> -> vector<2x64xf32>
    %124 = arith.addf %119, %123 : vector<2x64xf32>
    %125 = vector.extract_strided_slice %93 {offsets = [12, 0], sizes = [2, 64], strides = [1, 1]} : vector<18x64xf32> to vector<2x64xf32>
    %126 = arith.truncf %125 : vector<2x64xf32> to vector<2x64xbf16>
    %c384_62 = arith.constant 384 : index
    %c0_63 = arith.constant 0 : index
    %127 = vector.load %arg6[%c384_62, %c0_63] : memref<576x64xbf16, #tpu.memory_space<vmem>>, vector<64x64xbf16>
    %cst_64 = arith.constant dense<0.000000e+00> : vector<2x64xf32>
    %128 = tpu.matmul %126, %127, %cst_64 {dimension_numbers = #tpu.dot_dimension_numbers<[1], [0], [0], [1], [0, 0, 1, 1], [], []>} : vector<2x64xbf16>, vector<64x64xbf16>, vector<2x64xf32> -> vector<2x64xf32>
    %129 = arith.addf %124, %128 : vector<2x64xf32>
    %130 = vector.extract_strided_slice %93 {offsets = [14, 0], sizes = [2, 64], strides = [1, 1]} : vector<18x64xf32> to vector<2x64xf32>
    %131 = arith.truncf %130 : vector<2x64xf32> to vector<2x64xbf16>
    %c448_65 = arith.constant 448 : index
    %c0_66 = arith.constant 0 : index
    %132 = vector.load %arg6[%c448_65, %c0_66] : memref<576x64xbf16, #tpu.memory_space<vmem>>, vector<64x64xbf16>
    %cst_67 = arith.constant dense<0.000000e+00> : vector<2x64xf32>
    %133 = tpu.matmul %131, %132, %cst_67 {dimension_numbers = #tpu.dot_dimension_numbers<[1], [0], [0], [1], [0, 0, 1, 1], [], []>} : vector<2x64xbf16>, vector<64x64xbf16>, vector<2x64xf32> -> vector<2x64xf32>
    %134 = arith.addf %129, %133 : vector<2x64xf32>
    %135 = vector.extract_strided_slice %93 {offsets = [16, 0], sizes = [2, 64], strides = [1, 1]} : vector<18x64xf32> to vector<2x64xf32>
    %136 = arith.truncf %135 : vector<2x64xf32> to vector<2x64xbf16>
    %c512 = arith.constant 512 : index
    %c0_68 = arith.constant 0 : index
    %137 = vector.load %arg6[%c512, %c0_68] : memref<576x64xbf16, #tpu.memory_space<vmem>>, vector<64x64xbf16>
    %cst_69 = arith.constant dense<0.000000e+00> : vector<2x64xf32>
    %138 = tpu.matmul %136, %137, %cst_69 {dimension_numbers = #tpu.dot_dimension_numbers<[1], [0], [0], [1], [0, 0, 1, 1], [], []>} : vector<2x64xbf16>, vector<64x64xbf16>, vector<2x64xf32> -> vector<2x64xf32>
    %139 = arith.addf %134, %138 : vector<2x64xf32>
    %c0_70 = arith.constant 0 : index
    %c0_71 = arith.constant 0 : index
    %140 = vector.load %arg7[%c0_70, %c0_71] : memref<1x64xf32, #tpu.memory_space<vmem>>, vector<1x64xf32>
    %141 = vector.broadcast %140 : vector<1x64xf32> to vector<2x64xf32>
    %142 = arith.addf %139, %141 : vector<2x64xf32>
    %cst_72 = arith.constant 0.000000e+00 : f32
    %143 = vector.broadcast %cst_72 : f32 to vector<2x64xf32>
    %144 = arith.maximumf %142, %143 : vector<2x64xf32>
    %145 = arith.truncf %144 : vector<2x64xf32> to vector<2x64xbf16>
    %c0_73 = arith.constant 0 : index
    %c0_74 = arith.constant 0 : index
    %146 = vector.load %arg8[%c0_73, %c0_74] : memref<64x512xbf16, #tpu.memory_space<vmem>>, vector<64x512xbf16>
    %cst_75 = arith.constant dense<0.000000e+00> : vector<2x512xf32>
    %147 = tpu.matmul %145, %146, %cst_75 {dimension_numbers = #tpu.dot_dimension_numbers<[1], [0], [0], [1], [0, 0, 1, 1], [], []>} : vector<2x64xbf16>, vector<64x512xbf16>, vector<2x512xf32> -> vector<2x512xf32>
    %c0_76 = arith.constant 0 : index
    %c0_77 = arith.constant 0 : index
    %148 = vector.load %arg9[%c0_76, %c0_77] : memref<1x512xf32, #tpu.memory_space<vmem>>, vector<1x512xf32>
    %149 = vector.broadcast %148 : vector<1x512xf32> to vector<2x512xf32>
    %150 = arith.addf %147, %149 : vector<2x512xf32>
    %cst_78 = arith.constant 0.000000e+00 : f32
    %151 = vector.broadcast %cst_78 : f32 to vector<2x512xf32>
    %152 = arith.maximumf %150, %151 : vector<2x512xf32>
    %153 = arith.truncf %152 : vector<2x512xf32> to vector<2x512xbf16>
    %c0_79 = arith.constant 0 : index
    %c0_80 = arith.constant 0 : index
    %154 = vector.load %arg10[%c0_79, %c0_80] : memref<512x4xbf16, #tpu.memory_space<vmem>>, vector<512x4xbf16>
    %cst_81 = arith.constant dense<0.000000e+00> : vector<2x4xf32>
    %155 = tpu.matmul %153, %154, %cst_81 {dimension_numbers = #tpu.dot_dimension_numbers<[1], [0], [0], [1], [0, 0, 1, 1], [], []>} : vector<2x512xbf16>, vector<512x4xbf16>, vector<2x4xf32> -> vector<2x4xf32>
    %c0_82 = arith.constant 0 : index
    %c0_83 = arith.constant 0 : index
    %156 = vector.load %arg11[%c0_82, %c0_83] : memref<1x4xf32, #tpu.memory_space<vmem>>, vector<1x4xf32>
    %157 = vector.broadcast %156 : vector<1x4xf32> to vector<2x4xf32>
    %158 = arith.addf %155, %157 : vector<2x4xf32>
    %c0_84 = arith.constant 0 : index
    %c0_85 = arith.constant 0 : index
    %159 = vector.load %arg12[%c0_84, %c0_85] : memref<2x4xf32, #tpu.memory_space<vmem>>, vector<2x4xf32>
    tpu.vector_store %arg12[%c0_84, %c0_85], %158 {strides = array<i32>} : memref<2x4xf32, #tpu.memory_space<vmem>>, vector<2x4xf32>,
    return
  }
  func.func @transform_0(%arg0: i32) -> (i32, i32) {
    %c0_i32 = arith.constant 0 : i32
    %c0_i32_0 = arith.constant 0 : i32
    %c0_i32_1 = arith.constant 0 : i32
    return %c0_i32, %c0_i32_0 : i32, i32
  }
  func.func @transform_1(%arg0: i32) -> (i32, i32) {
    %c0_i32 = arith.constant 0 : i32
    %c0_i32_0 = arith.constant 0 : i32
    %c0_i32_1 = arith.constant 0 : i32
    return %c0_i32, %c0_i32_0 : i32, i32
  }
  func.func @transform_2(%arg0: i32) -> (i32, i32) {
    %c0_i32 = arith.constant 0 : i32
    %c0_i32_0 = arith.constant 0 : i32
    %c0_i32_1 = arith.constant 0 : i32
    return %c0_i32, %c0_i32_0 : i32, i32
  }
  func.func @transform_3(%arg0: i32) -> (i32, i32) {
    %c0_i32 = arith.constant 0 : i32
    %c0_i32_0 = arith.constant 0 : i32
    %c0_i32_1 = arith.constant 0 : i32
    return %c0_i32, %c0_i32_0 : i32, i32
  }
  func.func @transform_4(%arg0: i32) -> (i32, i32) {
    %c0_i32 = arith.constant 0 : i32
    %c0_i32_0 = arith.constant 0 : i32
    %c0_i32_1 = arith.constant 0 : i32
    return %c0_i32, %c0_i32_0 : i32, i32
  }
  func.func @transform_5(%arg0: i32) -> (i32, i32) {
    %c0_i32 = arith.constant 0 : i32
    %c0_i32_0 = arith.constant 0 : i32
    %c0_i32_1 = arith.constant 0 : i32
    return %c0_i32, %c0_i32_0 : i32, i32
  }
  func.func @transform_6(%arg0: i32) -> (i32, i32) {
    %c0_i32 = arith.constant 0 : i32
    %c0_i32_0 = arith.constant 0 : i32
    %c0_i32_1 = arith.constant 0 : i32
    return %c0_i32, %c0_i32_0 : i32, i32
  }
  func.func @transform_7(%arg0: i32) -> (i32, i32) {
    %c0_i32 = arith.constant 0 : i32
    %c0_i32_0 = arith.constant 0 : i32
    %c0_i32_1 = arith.constant 0 : i32
    return %c0_i32, %c0_i32_0 : i32, i32
  }
  func.func @transform_8(%arg0: i32) -> (i32, i32) {
    %c0_i32 = arith.constant 0 : i32
    %c0_i32_0 = arith.constant 0 : i32
    %c0_i32_1 = arith.constant 0 : i32
    return %c0_i32, %c0_i32_0 : i32, i32
  }
  func.func @transform_9(%arg0: i32) -> (i32, i32) {
    %c0_i32 = arith.constant 0 : i32
    %c0_i32_0 = arith.constant 0 : i32
    %c0_i32_1 = arith.constant 0 : i32
    return %c0_i32, %c0_i32_0 : i32, i32
  }
  func.func @transform_10(%arg0: i32) -> (i32, i32) {
    %c0_i32 = arith.constant 0 : i32
    %c0_i32_0 = arith.constant 0 : i32
    %c0_i32_1 = arith.constant 0 : i32
    return %c0_i32, %c0_i32_0 : i32, i32
  }
  func.func @transform_11(%arg0: i32) -> (i32, i32) {
    %c0_i32 = arith.constant 0 : i32
    %c0_i32_0 = arith.constant 0 : i32
    %c0_i32_1 = arith.constant 0 : i32
    return %c0_i32, %c0_i32_0 : i32, i32
  }
}

</mosaic_0001>

<bundles_post_ra>
// kernel: net_forward.1
= control target key start
LH: loop header
LB: loop body
LE: loop exit
PB: predicated region body
PF: predicated region fallthrough
CT: control target
= control target key end

     0   :  { %v3973_v1 = vmov 0   ;;  %s4757_s0 = inlined_call_operand.vmem [shape: bf16[288,256], index: 0, kind: input, shape index: {}]   ;;  %s4758_s1 = inlined_call_operand.vmem [shape: bf16[256,32], index: 1, kind: input, shape index: {}]   ;;  %s4759_s2 = inlined_call_operand.vmem [shape: f32[1,32], index: 2, kind: input, shape index: {}]   ;;  %s4760_s3 = inlined_call_operand.vmem [shape: bf16[512,64], index: 3, kind: input, shape index: {}]   ;;  %s4761_s4 = inlined_call_operand.vmem [shape: f32[1,64], index: 4, kind: input, shape index: {}]   ;;  %s4762_s5 = inlined_call_operand.vmem [shape: bf16[576,64], index: 5, kind: input, shape index: {}]   ;;  %s4763_s6 = inlined_call_operand.vmem [shape: f32[1,64], index: 6, kind: input, shape index: {}]   ;;  %s4764_s7 = inlined_call_operand.vmem [shape: bf16[64,512], index: 7, kind: input, shape index: {}]   ;;  %s4765_s8 = inlined_call_operand.vmem [shape: f32[1,512], index: 8, kind: input, shape index: {}]   ;;  %s4766_s9 = inlined_call_operand.vmem [shape: bf16[512,4], index: 9, kind: input, shape index: {}]   ;;  %s4767_s10 = inlined_call_operand.vmem [shape: f32[1,4], index: 10, kind: input, shape index: {}]   ;;  %s4768_s11 = inlined_call_operand.hbm [shape: f32[2,4], index: 11, kind: output, shape index: {}]  }
   0x1   :  { %v3757_v0 = vld [vmem:[%s4758_s1 + $0x38] sm:$0xff]   ;;  %391 = vmatprep.subr.bf16.mxu0 %v3973_v1  ;;  %v3758_v2 = vld [vmem:[%s4758_s1 + $0x30] sm:$0xff]   ;;  %v3759_v3 = vld [vmem:[%s4758_s1 + $0x28] sm:$0xff]  }
   0x2   :  { %392 = vmatpush1.bf16.msra.mxu0 %v3757_v0  ;;  %v3760_v4 = vld [vmem:[%s4758_s1 + $0x20] sm:$0xff]   ;;  %v3761_v5 = vld [vmem:[%s4758_s1 + $0x18] sm:$0xff]   ;;  %v3762_v7 = vld [vmem:[%s4758_s1 + $0x10] sm:$0xff]  }
   0x3   :  { %393 = vmatprep.subr.bf16.mxu0 %v3973_v1  ;;  %v3775_v6 = vld [vmem:[%s4757_s0 + $0x4] ss:$8 sps:$4 sm:$0xff]   ;;  %v3765_v10 = vld [vmem:[%s4758_s1 + $0x78] sm:$0xff]   ;;  %v3766_v11 = vld [vmem:[%s4758_s1 + $0x70] sm:$0xff]  }
   0x4   :  { %423 = vmatprep.mubr.bf16.mxu0 %v3775_v6  ;;  %v3763_v8 = vld [vmem:[%s4758_s1 + $0x8] sm:$0xff]   ;;  %v3764_v9 = vld [vmem:[%s4758_s1] sm:$0xff]   ;;  %v3769_v14 = vld [vmem:[%s4758_s1 + $0x58] sm:$0xff]  }
   0x5   :  { %v3767_v12 = vld [vmem:[%s4758_s1 + $0x68] sm:$0xff]   ;;  %v3768_v13 = vld [vmem:[%s4758_s1 + $0x60] sm:$0xff]   ;;  %v3770_v15 = vld [vmem:[%s4758_s1 + $0x50] sm:$0xff]  }
   0x6   :  { %394 = vmatpush1.bf16.msra.mxu0 %v3758_v2  ;;  %v3771_v16 = vld [vmem:[%s4758_s1 + $0x48] sm:$0xff]   ;;  %v3772_v17 = vld [vmem:[%s4758_s1 + $0x40] sm:$0xff]   ;;  %v3776_v19 = vld [vmem:[%s4757_s0 + $0x14] ss:$8 sps:$4 sm:$0xff]  }
   0x7   :  { %395 = vmatprep.subr.bf16.mxu0 %v3973_v1  ;;  %v3773_v18 = vld [vmem:[%s4757_s0] ss:$8 sps:$4 sm:$0xff]   ;;  %v3778_v20 = vld [vmem:[%s4757_s0 + $0x10] ss:$8 sps:$4 sm:$0xff]   ;;  %v3779_v21 = vld [vmem:[%s4757_s0 + $0x24] ss:$8 sps:$4 sm:$0xff]  }
   0x8   :  { %v3781_v22 = vld [vmem:[%s4757_s0 + $0x20] ss:$8 sps:$4 sm:$0xff]   ;;  %v3782_v23 = vld [vmem:[%s4757_s0 + $0x34] ss:$8 sps:$4 sm:$0xff]   ;;  %v3784_v24 = vld [vmem:[%s4757_s0 + $0x30] ss:$8 sps:$4 sm:$0xff]  }
   0x9   :  { %v3785_v25 = vld [vmem:[%s4757_s0 + $0x44] ss:$8 sps:$4 sm:$0xff]   ;;  %v3787_v26 = vld [vmem:[%s4757_s0 + $0x40] ss:$8 sps:$4 sm:$0xff]   ;;  %v3788_v27 = vld [vmem:[%s4757_s0 + $0x54] ss:$8 sps:$4 sm:$0xff]  }
   0xa   :  { %396 = vmatpush1.bf16.msra.mxu0 %v3759_v3  ;;  %v3790_v28 = vld [vmem:[%s4757_s0 + $0x50] ss:$8 sps:$4 sm:$0xff]   ;;  %v3791_v29 = vld [vmem:[%s4757_s0 + $0x64] ss:$8 sps:$4 sm:$0xff]   ;;  %v3793_v30 = vld [vmem:[%s4757_s0 + $0x60] ss:$8 sps:$4 sm:$0xff]  }
   0xb   :  { %397 = vmatprep.subr.bf16.mxu0 %v3973_v1  ;;  %v3794_v31 = vld [vmem:[%s4757_s0 + $0x74] ss:$8 sps:$4 sm:$0xff]  }
   0xe   :  { %398 = vmatpush1.bf16.msra.mxu0 %v3760_v4 }
   0xf   :  { %399 = vmatprep.subr.bf16.mxu0 %v3973_v1 }
  0x12   :  { %400 = vmatpush1.bf16.msra.mxu0 %v3761_v5 }
  0x13   :  { %401 = vmatprep.subr.bf16.mxu0 %v3973_v1 }
  0x16   :  { %402 = vmatpush1.bf16.msra.mxu0 %v3762_v7 }
  0x17   :  { %403 = vmatprep.subr.bf16.mxu0 %v3973_v1 }
  0x1a   :  { %404 = vmatpush1.bf16.msra.mxu0 %v3763_v8 }
  0x1b   :  { %405 = vmatprep.subr.bf16.mxu0 %v3973_v1 }
  0x1e   :  { %406 = vmatpush1.bf16.msra.mxu0 %v3764_v9 }
  0x1f   :  { %407 = vmatprep.subr.bf16.mxu0 %v3973_v1 }
  0x22   :  { %408 = vmatpush2.bf16.msra.mxu0 %v3765_v10 }
  0x23   :  { %409 = vmatprep.subr.bf16.mxu0 %v3973_v1 }
  0x26   :  { %410 = vmatpush2.bf16.msra.mxu0 %v3766_v11 }
  0x27   :  { %411 = vmatprep.subr.bf16.mxu0 %v3973_v1 }
  0x2a   :  { %412 = vmatpush2.bf16.msra.mxu0 %v3767_v12 }
  0x2b   :  { %413 = vmatprep.subr.bf16.mxu0 %v3973_v1 }
  0x2e   :  { %414 = vmatpush2.bf16.msra.mxu0 %v3768_v13 }
  0x2f   :  { %415 = vmatprep.subr.bf16.mxu0 %v3973_v1 }
  0x32   :  { %416 = vmatpush2.bf16.msra.mxu0 %v3769_v14 }
  0x33   :  { %417 = vmatprep.subr.bf16.mxu0 %v3973_v1 }
  0x36   :  { %418 = vmatpush2.bf16.msra.mxu0 %v3770_v15 }
  0x37   :  { %419 = vmatprep.subr.bf16.mxu0 %v3973_v1 }
  0x3a   :  { %420 = vmatpush2.bf16.msra.mxu0 %v3771_v16 }
  0x3b   :  { %421 = vmatprep.subr.bf16.mxu0 %v3973_v1 }
  0x3e   :  { %422 = vmatpush2.bf16.msra.mxu0 %v3772_v17 }
  0x41   :  { %424 = vmatmul.mubr.bf16.vlgmr.msra.gmra.mxu0 %v3773_v18 }
  0x42   :  { %431 = vmatprep.mubr.bf16.mxu0 %v3776_v19 }
  0x49   :  { %432 = vmatmul.mubr.bf16.gmra.mxu0 %v3778_v20 }
  0x4a   :  { %439 = vmatprep.mubr.bf16.mxu0 %v3779_v21 }
  0x51   :  { %440 = vmatmul.mubr.bf16.gmra.mxu0 %v3781_v22 }
  0x52   :  { %447 = vmatprep.mubr.bf16.mxu0 %v3782_v23 }
  0x59   :  { %448 = vmatmul.mubr.bf16.gmra.mxu0 %v3784_v24 }
  0x5a   :  { %455 = vmatprep.mubr.bf16.mxu0 %v3785_v25 }
  0x61   :  { %456 = vmatmul.mubr.bf16.gmra.mxu0 %v3787_v26 }
  0x62   :  { %463 = vmatprep.mubr.bf16.mxu0 %v3788_v27 }
  0x69   :  { %464 = vmatmul.mubr.bf16.gmra.mxu0 %v3790_v28 }
  0x6a   :  { %471 = vmatprep.mubr.bf16.mxu0 %v3791_v29 }
  0x6b   :  { %16 = vsyncpa [#allocation3], 0  ;;  %v3796_v32 = vld [vmem:[%s4757_s0 + $0x70] ss:$8 sps:$4 sm:$0xff]   ;;  %v3797_v33 = vld [vmem:[%s4757_s0 + $0x84] ss:$8 sps:$4 sm:$0xff]  }
  0x6c   :  { %v3799_v34 = vld [vmem:[%s4757_s0 + $0x80] ss:$8 sps:$4 sm:$0xff]   ;;  %v3800_v35 = vld [vmem:[%s4757_s0 + $0x94] ss:$8 sps:$4 sm:$0xff]   ;;  %v3802_v36 = vld [vmem:[%s4757_s0 + $0x90] ss:$8 sps:$4 sm:$0xff]  }
  0x6d   :  { %v3803_v37 = vld [vmem:[%s4757_s0 + $0xa4] ss:$8 sps:$4 sm:$0xff]   ;;  %v3805_v38 = vld [vmem:[%s4757_s0 + $0xa0] ss:$8 sps:$4 sm:$0xff]   ;;  %v3806_v39 = vld [vmem:[%s4757_s0 + $0xb4] ss:$8 sps:$4 sm:$0xff]  }
  0x6e   :  { %v3827_v40 = vld [vmem:[%s4760_s3 + $0x18] sm:$0xff]   ;;  %v3809_v42 = vld [vmem:[%s4757_s0 + $0xc4] ss:$8 sps:$4 sm:$0xff]   ;;  %v3828_v43 = vld [vmem:[%s4760_s3 + $0x10] sm:$0xff]   ;;  %vm618_vm0 = vcmask 1046528   ;;  %vm634_vm1 = vcmask 261120  }
  0x6f   :  { %3517 = vmatprep.subr.bf16.mxu1 %v3827_v40  ;;  %v3808_v41 = vld [vmem:[%s4757_s0 + $0xb0] ss:$8 sps:$4 sm:$0xff]   ;;  %v4185_v44 = vld [vmem:[%s4760_s3 + $0x8] sm:$0xff]   ;;  %v3812_v46 = vld [vmem:[%s4757_s0 + $0xd4] ss:$8 sps:$4 sm:$0xff]   ;;  %vm763_vm2 = vcmask 1045504  }
  0x70   :  { %3518 = vmatpush3.bf16.msra.mxu1 %v3827_v40  ;;  %v3811_v45 = vld [vmem:[%s4757_s0 + $0xc0] ss:$8 sps:$4 sm:$0xff]   ;;  %v3814_v47 = vld [vmem:[%s4757_s0 + $0xd0] ss:$8 sps:$4 sm:$0xff]   ;;  %v3815_v48 = vld [vmem:[%s4757_s0 + $0xe4] ss:$8 sps:$4 sm:$0xff]  }
  0x71   :  { %472 = vmatmul.mubr.bf16.gmra.mxu0 %v3793_v30  ;;  %3519 = vmatprep.subr.bf16.mxu1 %v3828_v43  ;;  %v3817_v49 = vld [vmem:[%s4757_s0 + $0xe0] ss:$8 sps:$4 sm:$0xff]   ;;  %v3818_v50 = vld [vmem:[%s4757_s0 + $0xf4] ss:$8 sps:$4 sm:$0xff]   ;;  %v3820_v51 = vld [vmem:[%s4757_s0 + $0xf0] ss:$8 sps:$4 sm:$0xff]  }
  0x72   :  { %479 = vmatprep.mubr.bf16.mxu0 %v3794_v31  ;;  %v3821_v52 = vld [vmem:[%s4757_s0 + $0x104] ss:$8 sps:$4 sm:$0xff]   ;;  %v3823_v53 = vld [vmem:[%s4757_s0 + $0x100] ss:$8 sps:$4 sm:$0xff]   ;;  %v3824_v54 = vld [vmem:[%s4757_s0 + $0x114] ss:$8 sps:$4 sm:$0xff]  }
  0x73   :  { %v3826_v55 = vld [vmem:[%s4757_s0 + $0x110] ss:$8 sps:$4 sm:$0xff]   ;;  %v4224_v62 = vld [vmem:[%s4759_s2] ss:$0 sm:$0xff]  ;;  %vm844_vm3 = vcmask 1044480   ;;  %vm3975_vm4 = vmmov 0  }
  0x74   :  { %3520 = vmatpush3.bf16.msra.mxu1 %v3828_v43  ;;  %v3830_v25 = vld [vmem:[%s4760_s3] sm:$0xff]   ;;  %vm1918_vm5 = vcmask 523264   ;;  %vm3133_vm6 = vcmask 25600  }
  0x75   :  { %3525 = vmatprep.subr.bf16.mxu1 %v4185_v44 }
  0x79   :  { %480 = vmatmul.mubr.bf16.gmra.mxu0 %v3796_v32 }
  0x7a   :  { %487 = vmatprep.mubr.bf16.mxu0 %v3797_v33  ;;  %v3831_v33 = vld [vmem:[%s4760_s3 + $0x28] sm:$0xff]  }
  0x81   :  { %488 = vmatmul.mubr.bf16.gmra.mxu0 %v3799_v34 }
  0x82   :  { %495 = vmatprep.mubr.bf16.mxu0 %v3800_v35 }
  0x89   :  { %496 = vmatmul.mubr.bf16.gmra.mxu0 %v3802_v36 }
  0x8a   :  { %503 = vmatprep.mubr.bf16.mxu0 %v3803_v37 }
  0x91   :  { %504 = vmatmul.mubr.bf16.gmra.mxu0 %v3805_v38 }
  0x92   :  { %511 = vmatprep.mubr.bf16.mxu0 %v3806_v39 }
  0x99   :  { %512 = vmatmul.mubr.bf16.gmra.mxu0 %v3808_v41  ;;  %v3832_v41 = vld [vmem:[%s4760_s3 + $0x20] sm:$0xff]  }
  0x9a   :  { %519 = vmatprep.mubr.bf16.mxu0 %v3809_v42 }
  0xa1   :  { %520 = vmatmul.mubr.bf16.gmra.mxu0 %v3811_v45 }
  0xa2   :  { %527 = vmatprep.mubr.bf16.mxu0 %v3812_v46 }
  0xa9   :  { %528 = vmatmul.mubr.bf16.gmra.mxu0 %v3814_v47 }
  0xaa   :  { %535 = vmatprep.mubr.bf16.mxu0 %v3815_v48  ;;  %v3833_v48 = vld [vmem:[%s4760_s3 + $0x38] sm:$0xff]  }
  0xb1   :  { %536 = vmatmul.mubr.bf16.gmra.mxu0 %v3817_v49 }
  0xb2   :  { %543 = vmatprep.mubr.bf16.mxu0 %v3818_v50 }
  0xb9   :  { %544 = vmatmul.mubr.bf16.gmra.mxu0 %v3820_v51 }
  0xba   :  { %551 = vmatprep.mubr.bf16.mxu0 %v3821_v52 }
  0xc1   :  { %552 = vmatmul.mubr.bf16.gmra.mxu0 %v3823_v53  ;;  %v3834_v53 = vld [vmem:[%s4760_s3 + $0x30] sm:$0xff]  }
  0xc2   :  { %559 = vmatprep.mubr.bf16.mxu0 %v3824_v54 }
  0xc9   :  { %560 = vmatmul.mubr.bf16.gmra.mxu0 %v3826_v55 }
 0x101   :  { %v425_v56 = vpop.f32.mrf.mxu0 }
 0x102   :  { %v426_v12 = vadd.f32 %v4224_v62, %v425_v56 }
 0x103   :  { %v427_v57 = vpop.f32.mrf.mxu0 }
 0x104   :  { %v568_v20 = vmax.f32 %v426_v12, 0.0 }
 0x105   :  { %v428_v58 = vpop.f32.mrf.mxu0 }
 0x106   :  { %v429_v8 = vadd.f32 %v4224_v62, %v428_v58 }
 0x107   :  { %v430_v59 = vpop.f32.mrf.mxu0 }
 0x108   :  { %v569_v16 = vmax.f32 %v429_v8, 0.0  ;;  %v3835_v59 = vld [vmem:[%s4760_s3 + $0x48] sm:$0xff]  }
 0x109   :  { %v433_v60 = vpop.f32.mrf.mxu0 }
 0x10a   :  { %v434_v0 = vadd.f32 %v4224_v62, %v433_v60  ;;  %v604_v26 = vpack.c.bf16 %v569_v16, %v568_v20 }
 0x10b   :  { %v435_v61 = vpop.f32.mrf.mxu0 }
 0x10c   :  { %v570_v6 = vmax.f32 %v434_v0, 0.0 }
 0x10d   :  { %v436_v63 = vpop.f32.mrf.mxu0 }
 0x10e   :  { %v437_v2 = vadd.f32 %v4224_v62, %v436_v63  ;;  %v605_v37 = vpack.c.bf16 %v570_v6, %v570_v6 }
 0x10f   :  { %v438_v3 = vpop.f32.mrf.mxu0 }
 0x110   :  { %v571_v4 = vmax.f32 %v437_v2, 0.0 }
 0x111   :  { %v441_v5 = vpop.f32.mrf.mxu0 }
 0x112   :  { %v442_v7 = vadd.f32 %v4224_v62, %v441_v5  ;;  %v610_v10 = vpack.c.bf16 %v571_v4, %v570_v6  ;;  %v3836_v4 = vld [vmem:[%s4760_s3 + $0x40] sm:$0xff]  }
 0x113   :  { %v443_v9 = vpop.f32.mrf.mxu0 }
 0x114   :  { %v572_v11 = vmax.f32 %v442_v7, 0.0  ;;  %v619_v18 = vrot.slane %v610_v10, 1 }
 0x115   :  { %v444_v13 = vpop.f32.mrf.mxu0 }
 0x116   :  { %v611_v14 = vpack.c.bf16 %v572_v11, %v572_v11  ;;  %v445_v15 = vadd.f32 %v4224_v62, %v444_v13 }
 0x117   :  { %v446_v17 = vpop.f32.mrf.mxu0 }
 0x118   :  { %v620_v19 = vrot.slane %v611_v14, 1  ;;  %v573_v22 = vmax.f32 %v445_v15, 0.0 }
 0x119   :  { %v449_v21 = vpop.f32.mrf.mxu0 }
 0x11a   :  { %v450_v23 = vadd.f32 %v4224_v62, %v449_v21  ;;  %v621_v24 = vsel %vm618_vm0, %v619_v18, %v620_v19  ;;  %v755_v30 = vpack.c.bf16 %v573_v22, %v572_v11  ;;  %v3837_v11 = vld [vmem:[%s4760_s3 + $0x58] sm:$0xff]  }
 0x11b   :  { %v451_v27 = vpop.f32.mrf.mxu0  ;;  %3521 = vmatprep.mubr.msk.bf16.mxu1 %vm634_vm1, %v621_v24 }
 0x11c   :  { %v574_v28 = vmax.f32 %v450_v23, 0.0  ;;  %3522 = vmatmul.mubr.msk.bf16.vlgmr.msra.gmra.mxu1 %vm634_vm1, %v620_v19  ;;  %v764_v38 = vrot.slane %v755_v30, 2  ;;  %v3838_v19 = vld [vmem:[%s4760_s3 + $0x50] sm:$0xff]   ;;  %v3839_v27 = vld [vmem:[%s4760_s3 + $0x68] sm:$0xff]  }
 0x11d   :  { %v452_v29 = vpop.f32.mrf.mxu0  ;;  %3526 = vmatpush3.bf16.msra.mxu1 %v4185_v44  ;;  %3529 = vmatprep.mubr.msk.bf16.mxu1 %vm634_vm1, %v604_v26 }
 0x11e   :  { %v756_v31 = vpack.c.bf16 %v574_v28, %v574_v28  ;;  %v453_v32 = vadd.f32 %v4224_v62, %v452_v29  ;;  %3527 = vmatprep.subr.bf16.mxu1 %v3830_v25 }
 0x11f   :  { %v454_v34 = vpop.f32.mrf.mxu0 }
 0x120   :  { %v765_v35 = vrot.slane %v756_v31, 2  ;;  %v575_v39 = vmax.f32 %v453_v32, 0.0  ;;  %v3840_v34 = vld [vmem:[%s4760_s3 + $0x60] sm:$0xff]  }
 0x121   :  { %v457_v36 = vpop.f32.mrf.mxu0  ;;  %3528 = vmatpush3.bf16.msra.mxu1 %v3830_v25 }
 0x122   :  { %v458_v40 = vadd.f32 %v4224_v62, %v457_v36  ;;  %3533 = vmatprep.subr.bf16.mxu1 %v3831_v33  ;;  %v766_v44 = vsel %vm763_vm2, %v764_v38, %v765_v35  ;;  %v836_v46 = vpack.c.bf16 %v575_v39, %v574_v28 }
 0x123   :  { %v459_v42 = vpop.f32.mrf.mxu0 }
 0x124   :  { %v576_v43 = vmax.f32 %v458_v40, 0.0  ;;  %3530 = vmatmul.mubr.msk.bf16.vlgmr.msra.gmra.mxu1 %vm634_vm1, %v605_v37  ;;  %v845_v52 = vrot.slane %v836_v46, 3  ;;  %v3841_v42 = vld [vmem:[%s4760_s3 + $0x78] sm:$0xff]  }
 0x125   :  { %v460_v45 = vpop.f32.mrf.mxu0  ;;  %3534 = vmatpush3.bf16.msra.mxu1 %v3831_v33  ;;  %3537 = vmatprep.mubr.msk.bf16.mxu1 %vm634_vm1, %v766_v44 }
 0x126   :  { %v837_v47 = vpack.c.bf16 %v576_v43, %v576_v43  ;;  %3535 = vmatprep.subr.bf16.mxu1 %v3832_v41  ;;  %v461_v57 = vadd.f32 %v4224_v62, %v460_v45 }
 0x127   :  { %v462_v49 = vpop.f32.mrf.mxu0 }
 0x128   :  { %v846_v50 = vrot.slane %v837_v47, 3  ;;  %v577_v63 = vmax.f32 %v461_v57, 0.0 }
 0x129   :  { %v465_v51 = vpop.f32.mrf.mxu0  ;;  %3536 = vmatpush3.bf16.msra.mxu1 %v3832_v41 }
 0x12a   :  { %3541 = vmatprep.subr.bf16.mxu1 %v3833_v48  ;;  %v466_v54 = vadd.f32 %v4224_v62, %v465_v51  ;;  %v847_v56 = vsel %vm844_vm3, %v845_v52, %v846_v50 }
 0x12b   :  { %v467_v55 = vpop.f32.mrf.mxu0 }
 0x12c   :  { %3538 = vmatmul.mubr.msk.bf16.vlgmr.msra.gmra.mxu1 %vm634_vm1, %v765_v35  ;;  %v578_v60 = vmax.f32 %v466_v54, 0.0 }
 0x12d   :  { %v468_v58 = vpop.f32.mrf.mxu0  ;;  %3542 = vmatpush3.bf16.msra.mxu1 %v3833_v48  ;;  %3545 = vmatprep.mubr.msk.bf16.mxu1 %vm634_vm1, %v847_v56  ;;  %v3842_v48 = vld [vmem:[%s4760_s3 + $0x70] sm:$0xff]   ;;  %v3843_v56 = vld [vmem:[%s4760_s3 + $0x88] sm:$0xff]  }
 0x12e   :  { %3543 = vmatprep.subr.bf16.mxu1 %v3834_v53  ;;  %v469_v2 = vadd.f32 %v4224_v62, %v468_v58  ;;  %v917_v5 = vpack.c.bf16 %v578_v60, %v577_v63 }
 0x12f   :  { %v470_v61 = vpop.f32.mrf.mxu0 }
 0x130   :  { %v579_v9 = vmax.f32 %v469_v2, 0.0 }
 0x131   :  { %v473_v0 = vpop.f32.mrf.mxu0  ;;  %3544 = vmatpush3.bf16.msra.mxu1 %v3834_v53 }
 0x132   :  { %v474_v3 = vadd.f32 %v4224_v62, %v473_v0  ;;  %3549 = vmatprep.subr.bf16.mxu1 %v3835_v59  ;;  %v918_v16 = vpack.c.bf16 %v579_v9, %v579_v9  ;;  %v3844_v0 = vld [vmem:[%s4760_s3 + $0x80] sm:$0xff]  }
 0x133   :  { %v475_v6 = vpop.f32.mrf.mxu0 }
 0x134   :  { %v580_v7 = vmax.f32 %v474_v3, 0.0  ;;  %3546 = vmatmul.mubr.msk.bf16.vlgmr.msra.gmra.mxu1 %vm634_vm1, %v846_v50  ;;  %v3845_v6 = vld [vmem:[%s4760_s3 + $0x98] sm:$0xff]  }
 0x135   :  { %v476_v8 = vpop.f32.mrf.mxu0  ;;  %3550 = vmatpush3.bf16.msra.mxu1 %v3835_v59  ;;  %3553 = vmatprep.mubr.msk.bf16.mxu1 %vm634_vm1, %v917_v5 }
 0x136   :  { %v477_v10 = vadd.f32 %v4224_v62, %v476_v8  ;;  %3551 = vmatprep.subr.bf16.mxu1 %v3836_v4  ;;  %v992_v13 = vpack.c.bf16 %v580_v7, %v579_v9 }
 0x137   :  { %v478_v12 = vpop.f32.mrf.mxu0 }
 0x138   :  { %v581_v14 = vmax.f32 %v477_v10, 0.0  ;;  %v1000_v21 = vrot.slane %v992_v13, 1  ;;  %v3846_v12 = vld [vmem:[%s4760_s3 + $0x90] sm:$0xff]  }
 0x139   :  { %v481_v15 = vpop.f32.mrf.mxu0  ;;  %3552 = vmatpush3.bf16.msra.mxu1 %v3836_v4 }
 0x13a   :  { %v993_v17 = vpack.c.bf16 %v581_v14, %v581_v14  ;;  %v482_v18 = vadd.f32 %v4224_v62, %v481_v15  ;;  %3557 = vmatprep.subr.bf16.mxu1 %v3837_v11 }
 0x13b   :  { %v483_v20 = vpop.f32.mrf.mxu0 }
 0x13c   :  { %v1001_v22 = vrot.slane %v993_v17, 1  ;;  %v582_v23 = vmax.f32 %v482_v18, 0.0  ;;  %3554 = vmatmul.mubr.msk.bf16.vlgmr.msra.gmra.mxu1 %vm634_vm1, %v918_v16 }
 0x13d   :  { %v484_v24 = vpop.f32.mrf.mxu0  ;;  %3558 = vmatpush3.bf16.msra.mxu1 %v3837_v11 }
 0x13e   :  { %v485_v25 = vadd.f32 %v4224_v62, %v484_v24  ;;  %v1002_v26 = vsel %vm618_vm0, %v1000_v21, %v1001_v22  ;;  %3559 = vmatprep.subr.bf16.mxu1 %v3838_v19  ;;  %v1072_v29 = vpack.c.bf16 %v582_v23, %v581_v14 }
 0x13f   :  { %v486_v28 = vpop.f32.mrf.mxu0  ;;  %3561 = vmatprep.mubr.msk.bf16.mxu1 %vm634_vm1, %v1002_v26 }
 0x140   :  { %v583_v30 = vmax.f32 %v485_v25, 0.0  ;;  %v1080_v36 = vrot.slane %v1072_v29, 2 }
 0x141   :  { %v489_v31 = vpop.f32.mrf.mxu0  ;;  %3560 = vmatpush3.bf16.msra.mxu1 %v3838_v19  ;;  %v3847_v19 = vld [vmem:[%s4760_s3 + $0xa8] sm:$0xff]  }
 0x142   :  { %v1073_v32 = vpack.c.bf16 %v583_v30, %v583_v30  ;;  %v490_v33 = vadd.f32 %v4224_v62, %v489_v31  ;;  %3565 = vmatprep.subr.bf16.mxu1 %v3839_v27 }
 0x143   :  { %v491_v35 = vpop.f32.mrf.mxu0 }
 0x144   :  { %v1081_v37 = vrot.slane %v1073_v32, 2  ;;  %v584_v38 = vmax.f32 %v490_v33, 0.0  ;;  %3562 = vmatmul.mubr.msk.bf16.vlgmr.msra.gmra.mxu1 %vm634_vm1, %v1001_v22 }
 0x145   :  { %v492_v39 = vpop.f32.mrf.mxu0  ;;  %3566 = vmatpush3.bf16.msra.mxu1 %v3839_v27  ;;  %v3848_v27 = vld [vmem:[%s4760_s3 + $0xa0] sm:$0xff]  }
 0x146   :  { %v493_v40 = vadd.f32 %v4224_v62, %v492_v39  ;;  %v1082_v41 = vsel %vm763_vm2, %v1080_v36, %v1081_v37  ;;  %3567 = vmatprep.subr.bf16.mxu1 %v3840_v34  ;;  %v1152_v44 = vpack.c.bf16 %v584_v38, %v583_v30 }
 0x147   :  { %v494_v43 = vpop.f32.mrf.mxu0  ;;  %3569 = vmatprep.mubr.msk.bf16.mxu1 %vm634_vm1, %v1082_v41 }
 0x148   :  { %v585_v45 = vmax.f32 %v493_v40, 0.0  ;;  %v1160_v50 = vrot.slane %v1152_v44, 3 }
 0x149   :  { %v497_v46 = vpop.f32.mrf.mxu0  ;;  %3568 = vmatpush3.bf16.msra.mxu1 %v3840_v34  ;;  %v3849_v34 = vld [vmem:[%s4760_s3 + $0xb8] sm:$0xff]  }
 0x14a   :  { %v1153_v47 = vpack.c.bf16 %v585_v45, %v585_v45  ;;  %3573 = vmatprep.subr.bf16.mxu1 %v3841_v42  ;;  %v498_v52 = vadd.f32 %v4224_v62, %v497_v46 }
 0x14b   :  { %v499_v49 = vpop.f32.mrf.mxu0 }
 0x14c   :  { %v1161_v51 = vrot.slane %v1153_v47, 3  ;;  %3570 = vmatmul.mubr.msk.bf16.vlgmr.msra.gmra.mxu1 %vm634_vm1, %v1081_v37  ;;  %v586_v58 = vmax.f32 %v498_v52, 0.0 }
 0x14d   :  { %v500_v53 = vpop.f32.mrf.mxu0  ;;  %3574 = vmatpush3.bf16.msra.mxu1 %v3841_v42  ;;  %v3850_v42 = vld [vmem:[%s4760_s3 + $0xb0] sm:$0xff]  }
 0x14e   :  { %v501_v54 = vadd.f32 %v4224_v62, %v500_v53  ;;  %v1162_v55 = vsel %vm844_vm3, %v1160_v50, %v1161_v51  ;;  %3575 = vmatprep.subr.bf16.mxu1 %v3842_v48 }
 0x14f   :  { %v502_v57 = vpop.f32.mrf.mxu0  ;;  %3577 = vmatprep.mubr.msk.bf16.mxu1 %vm634_vm1, %v1162_v55 }
 0x150   :  { %v587_v59 = vmax.f32 %v501_v54, 0.0 }
 0x151   :  { %v505_v60 = vpop.f32.mrf.mxu0  ;;  %3576 = vmatpush3.bf16.msra.mxu1 %v3842_v48  ;;  %v3851_v48 = vld [vmem:[%s4760_s3 + $0xc8] sm:$0xff]  }
 0x152   :  { %v1232_v61 = vpack.c.bf16 %v587_v59, %v586_v58  ;;  %v506_v63 = vadd.f32 %v4224_v62, %v505_v60  ;;  %3581 = vmatprep.subr.bf16.mxu1 %v3843_v56 }
 0x153   :  { %v507_v2 = vpop.f32.mrf.mxu0 }
 0x154   :  { %3578 = vmatmul.mubr.msk.bf16.vlgmr.msra.gmra.mxu1 %vm634_vm1, %v1161_v51  ;;  %v588_v4 = vmax.f32 %v506_v63, 0.0 }
 0x155   :  { %v508_v3 = vpop.f32.mrf.mxu0  ;;  %3582 = vmatpush3.bf16.msra.mxu1 %v3843_v56  ;;  %3585 = vmatprep.mubr.msk.bf16.mxu1 %vm634_vm1, %v1232_v61  ;;  %v3852_v56 = vld [vmem:[%s4760_s3 + $0xc0] sm:$0xff]  }
 0x156   :  { %v509_v5 = vadd.f32 %v4224_v62, %v508_v3  ;;  %3583 = vmatprep.subr.bf16.mxu1 %v3844_v0  ;;  %v1233_v10 = vpack.c.bf16 %v588_v4, %v588_v4 }
 0x157   :  { %v510_v7 = vpop.f32.mrf.mxu0 }
 0x158   :  { %v589_v8 = vmax.f32 %v509_v5, 0.0  ;;  %v3854_v7 = vld [vmem:[%s4760_s3 + $0xd0] sm:$0xff]  }
 0x159   :  { %v513_v9 = vpop.f32.mrf.mxu0  ;;  %3584 = vmatpush3.bf16.msra.mxu1 %v3844_v0  ;;  %v3853_v0 = vld [vmem:[%s4760_s3 + $0xd8] sm:$0xff]  }
 0x15a   :  { %v514_v11 = vadd.f32 %v4224_v62, %v513_v9  ;;  %3589 = vmatprep.subr.bf16.mxu1 %v3845_v6  ;;  %v1307_v14 = vpack.c.bf16 %v589_v8, %v588_v4 }
 0x15b   :  { %v515_v13 = vpop.f32.mrf.mxu0 }
 0x15c   :  { %v590_v15 = vmax.f32 %v514_v11, 0.0  ;;  %3586 = vmatmul.mubr.msk.bf16.vlgmr.msra.gmra.mxu1 %vm634_vm1, %v1233_v10  ;;  %v1315_v21 = vrot.slane %v1307_v14, 1 }
 0x15d   :  { %v516_v16 = vpop.f32.mrf.mxu0  ;;  %3590 = vmatpush3.bf16.msra.mxu1 %v3845_v6 }
 0x15e   :  { %v1308_v17 = vpack.c.bf16 %v590_v15, %v590_v15  ;;  %v517_v18 = vadd.f32 %v4224_v62, %v516_v16  ;;  %3591 = vmatprep.subr.bf16.mxu1 %v3846_v12 }
 0x15f   :  { %v518_v20 = vpop.f32.mrf.mxu0 }
 0x160   :  { %v1316_v22 = vrot.slane %v1308_v17, 1  ;;  %v591_v23 = vmax.f32 %v517_v18, 0.0 }
 0x161   :  { %v521_v24 = vpop.f32.mrf.mxu0  ;;  %3592 = vmatpush3.bf16.msra.mxu1 %v3846_v12  ;;  %v3855_v12 = vld [vmem:[%s4760_s3 + $0xe8] sm:$0xff]  }
 0x162   :  { %v522_v25 = vadd.f32 %v4224_v62, %v521_v24  ;;  %v1317_v26 = vsel %vm618_vm0, %v1315_v21, %v1316_v22  ;;  %3597 = vmatprep.subr.bf16.mxu1 %v3847_v19  ;;  %v1387_v29 = vpack.c.bf16 %v591_v23, %v590_v15 }
 0x163   :  { %v523_v28 = vpop.f32.mrf.mxu0  ;;  %3593 = vmatprep.mubr.msk.bf16.mxu1 %vm634_vm1, %v1317_v26  ;;  %v3856_v26 = vld [vmem:[%s4760_s3 + $0xe0] sm:$0xff]  }
 0x164   :  { %v592_v30 = vmax.f32 %v522_v25, 0.0  ;;  %3594 = vmatmul.mubr.msk.bf16.vlgmr.msra.gmra.mxu1 %vm634_vm1, %v1316_v22  ;;  %v1395_v36 = vrot.slane %v1387_v29, 2  ;;  %v3859_v28 = vld [vmem:[%s4762_s5 + $0x98] sm:$0xff]  }
 0x165   :  { %v524_v31 = vpop.f32.mrf.mxu0  ;;  %3598 = vmatpush3.bf16.msra.mxu1 %v3847_v19 }
 0x166   :  { %v1388_v32 = vpack.c.bf16 %v592_v30, %v592_v30  ;;  %v525_v33 = vadd.f32 %v4224_v62, %v524_v31  ;;  %3599 = vmatprep.subr.bf16.mxu1 %v3848_v27  ;;  %v3974_v31 = vmov 0.0  }
 0x167   :  { %v526_v35 = vpop.f32.mrf.mxu0  ;;  %3693 = vmatprep.subr.bf16.mxu0 %v3974_v31  ;;  %3701 = vmatprep.mubr.msk.bf16.mxu0 %vm3975_vm4, %v3974_v31 }
 0x168   :  { %v1396_v37 = vrot.slane %v1388_v32, 2  ;;  %v593_v38 = vmax.f32 %v525_v33, 0.0  ;;  %3694 = vmatpush3.bf16.msra.mxu0 %v3859_v28  ;;  %v3857_v35 = vld [vmem:[%s4760_s3 + $0xf8] sm:$0xff]  }
 0x169   :  { %v529_v39 = vpop.f32.mrf.mxu0  ;;  %3600 = vmatpush3.bf16.msra.mxu1 %v3848_v27  ;;  %3695 = vmatprep.subr.bf16.mxu0 %v3974_v31 }
 0x16a   :  { %v530_v40 = vadd.f32 %v4224_v62, %v529_v39  ;;  %v1397_v41 = vsel %vm763_vm2, %v1395_v36, %v1396_v37  ;;  %3605 = vmatprep.subr.bf16.mxu1 %v3849_v34  ;;  %v1467_v44 = vpack.c.bf16 %v593_v38, %v592_v30 }
 0x16b   :  { %v531_v43 = vpop.f32.mrf.mxu0  ;;  %3601 = vmatprep.mubr.msk.bf16.mxu1 %vm634_vm1, %v1397_v41 }
 0x16c   :  { %v594_v45 = vmax.f32 %v530_v40, 0.0  ;;  %3602 = vmatmul.mubr.msk.bf16.vlgmr.msra.gmra.mxu1 %vm634_vm1, %v1396_v37  ;;  %v1475_v50 = vrot.slane %v1467_v44, 3  ;;  %v3858_v43 = vld [vmem:[%s4760_s3 + $0xf0] sm:$0xff]  }
 0x16d   :  { %v532_v46 = vpop.f32.mrf.mxu0  ;;  %3606 = vmatpush3.bf16.msra.mxu1 %v3849_v34 }
 0x16e   :  { %v1468_v47 = vpack.c.bf16 %v594_v45, %v594_v45  ;;  %3607 = vmatprep.subr.bf16.mxu1 %v3850_v42  ;;  %v533_v52 = vadd.f32 %v4224_v62, %v532_v46 }
 0x16f   :  { %v534_v49 = vpop.f32.mrf.mxu0 }
 0x170   :  { %v1476_v51 = vrot.slane %v1468_v47, 3  ;;  %v595_v58 = vmax.f32 %v533_v52, 0.0  ;;  %v3862_v52 = vld [vmem:[%s4762_s5 + $0x38] sm:$0xff]  }
 0x171   :  { %v537_v53 = vpop.f32.mrf.mxu0  ;;  %3608 = vmatpush3.bf16.msra.mxu1 %v3850_v42 }
 0x172   :  { %v538_v54 = vadd.f32 %v4224_v62, %v537_v53  ;;  %v1477_v55 = vsel %vm844_vm3, %v1475_v50, %v1476_v51  ;;  %3613 = vmatprep.subr.bf16.mxu1 %v3851_v48  ;;  %v3860_v50 = vld [vmem:[%s4762_s5 + $0x90] sm:$0xff]  }
 0x173   :  { %v539_v57 = vpop.f32.mrf.mxu0  ;;  %3609 = vmatprep.mubr.msk.bf16.mxu1 %vm634_vm1, %v1477_v55  ;;  %3696 = vmatpush3.bf16.msra.mxu0 %v3860_v50  ;;  %v3863_v53 = vld [vmem:[%s4762_s5 + $0x30] sm:$0xff]  }
 0x174   :  { %v596_v59 = vmax.f32 %v538_v54, 0.0  ;;  %3610 = vmatmul.mubr.msk.bf16.vlgmr.msra.gmra.mxu1 %vm634_vm1, %v1476_v51  ;;  %3697 = vmatprep.subr.bf16.mxu0 %v3974_v31  ;;  %v3861_v51 = vld [vmem:[%s4762_s5 + $0x88] sm:$0xff]   ;;  %v3865_v57 = vld [vmem:[%s4762_s5 + $0x20] sm:$0xff]  }
 0x175   :  { %v540_v60 = vpop.f32.mrf.mxu0  ;;  %3614 = vmatpush3.bf16.msra.mxu1 %v3851_v48  ;;  %v3864_v54 = vld [vmem:[%s4762_s5 + $0x28] sm:$0xff]  }
 0x176   :  { %v1547_v61 = vpack.c.bf16 %v596_v59, %v595_v58  ;;  %v541_v63 = vadd.f32 %v4224_v62, %v540_v60  ;;  %3615 = vmatprep.subr.bf16.mxu1 %v3852_v56  ;;  %v3866_v59 = vld [vmem:[%s4762_s5 + $0x80] sm:$0xff]  }
 0x177   :  { %v542_v2 = vpop.f32.mrf.mxu0  ;;  %3698 = vmatpush3.bf16.msra.mxu0 %v3861_v51 }
 0x178   :  { %v597_v3 = vmax.f32 %v541_v63, 0.0  ;;  %3617 = vmatprep.mubr.msk.bf16.mxu1 %vm634_vm1, %v1547_v61  ;;  %3699 = vmatprep.subr.bf16.mxu0 %v3974_v31 }
 0x179   :  { %v545_v4 = vpop.f32.mrf.mxu0  ;;  %3616 = vmatpush3.bf16.msra.mxu1 %v3852_v56 }
 0x17a   :  { %v1548_v5 = vpack.c.bf16 %v597_v3, %v597_v3  ;;  %v546_v6 = vadd.f32 %v4224_v62, %v545_v4  ;;  %3621 = vmatprep.subr.bf16.mxu1 %v3853_v0 }
 0x17b   :  { %v547_v8 = vpop.f32.mrf.mxu0  ;;  %3700 = vmatpush3.bf16.msra.mxu0 %v3866_v59 }
 0x17c   :  { %v598_v9 = vmax.f32 %v546_v6, 0.0  ;;  %3618 = vmatmul.mubr.msk.bf16.vlgmr.msra.gmra.mxu1 %vm634_vm1, %v1548_v5  ;;  %3717 = vmatprep.subr.bf16.mxu0 %v3974_v31 }
 0x17d   :  { %v548_v10 = vpop.f32.mrf.mxu0  ;;  %3622 = vmatpush3.bf16.msra.mxu1 %v3853_v0 }
 0x17e   :  { %v549_v11 = vadd.f32 %v4224_v62, %v548_v10  ;;  %3623 = vmatprep.subr.bf16.mxu1 %v3854_v7  ;;  %v1622_v14 = vpack.c.bf16 %v598_v9, %v597_v3 }
 0x17f   :  { %v550_v13 = vpop.f32.mrf.mxu0 }
 0x180   :  { %v599_v15 = vmax.f32 %v549_v11, 0.0  ;;  %v1630_v20 = vrot.slane %v1622_v14, 1 }
 0x181   :  { %v553_v16 = vpop.f32.mrf.mxu0  ;;  %3624 = vmatpush3.bf16.msra.mxu1 %v3854_v7 }
 0x182   :  { %v1623_v17 = vpack.c.bf16 %v599_v15, %v599_v15  ;;  %v554_v18 = vadd.f32 %v4224_v62, %v553_v16  ;;  %3629 = vmatprep.subr.bf16.mxu1 %v3855_v12 }
 0x183   :  { %v555_v19 = vpop.f32.mrf.mxu0 }
 0x184   :  { %v1631_v21 = vrot.slane %v1623_v17, 1  ;;  %v600_v22 = vmax.f32 %v554_v18, 0.0 }
 0x185   :  { %v556_v23 = vpop.f32.mrf.mxu0 }
 0x186   :  { %v557_v24 = vadd.f32 %v4224_v62, %v556_v23  ;;  %v1632_v25 = vsel %vm618_vm0, %v1630_v20, %v1631_v21  ;;  %v1702_v29 = vpack.c.bf16 %v600_v22, %v599_v15 }
 0x187   :  { %v558_v27 = vpop.f32.mrf.mxu0  ;;  %3625 = vmatprep.mubr.msk.bf16.mxu1 %vm634_vm1, %v1632_v25 }
 0x188   :  { %v601_v30 = vmax.f32 %v557_v24, 0.0  ;;  %3626 = vmatmul.mubr.msk.bf16.vlgmr.msra.gmra.mxu1 %vm634_vm1, %v1631_v21  ;;  %v1710_v37 = vrot.slane %v1702_v29, 2 }
 0x189   :  { %3630 = vmatpush3.bf16.msra.mxu1 %v3855_v12  ;;  %v561_v32 = vpop.f32.mrf.mxu0 }
 0x18a   :  { %v1703_v33 = vpack.c.bf16 %v601_v30, %v601_v30  ;;  %v562_v34 = vadd.f32 %v4224_v62, %v561_v32  ;;  %3631 = vmatprep.subr.bf16.mxu1 %v3856_v26 }
 0x18b   :  { %v563_v36 = vpop.f32.mrf.mxu0 }
 0x18c   :  { %v1711_v38 = vrot.slane %v1703_v33, 2  ;;  %v602_v39 = vmax.f32 %v562_v34, 0.0 }
 0x18d   :  { %3632 = vmatpush3.bf16.msra.mxu1 %v3856_v26  ;;  %v564_v40 = vpop.f32.mrf.mxu0 }
 0x18e   :  { %v565_v41 = vadd.f32 %v4224_v62, %v564_v40  ;;  %v1712_v42 = vsel %vm763_vm2, %v1710_v37, %v1711_v38  ;;  %3637 = vmatprep.subr.bf16.mxu1 %v3857_v35  ;;  %v1782_v45 = vpack.c.bf16 %v602_v39, %v601_v30 }
 0x18f   :  { %v566_v44 = vpop.f32.mrf.mxu0  ;;  %3633 = vmatprep.mubr.msk.bf16.mxu1 %vm634_vm1, %v1712_v42 }
 0x190   :  { %v603_v46 = vmax.f32 %v565_v41, 0.0  ;;  %3634 = vmatmul.mubr.msk.bf16.vlgmr.msra.gmra.mxu1 %vm634_vm1, %v1711_v38  ;;  %v1790_v48 = vrot.slane %v1782_v45, 3 }
 0x191   :  { %3638 = vmatpush3.bf16.msra.mxu1 %v3857_v35 }
 0x192   :  { %v1783_v47 = vpack.c.bf16 %v603_v46, %v603_v46  ;;  %3639 = vmatprep.subr.bf16.mxu1 %v3858_v43 }
 0x194   :  { %v1791_v49 = vrot.slane %v1783_v47, 3 }
 0x195   :  { %3640 = vmatpush3.bf16.msra.mxu1 %v3858_v43 }
 0x196   :  { %v1792_v62 = vsel %vm844_vm3, %v1790_v48, %v1791_v49  ;;  %3645 = vmatprep.subr.bf16.mxu1 %v3974_v31 }
 0x197   :  { %3641 = vmatprep.mubr.msk.bf16.mxu1 %vm634_vm1, %v1792_v62 }
 0x198   :  { %3642 = vmatmul.mubr.msk.bf16.vlgmr.msra.gmra.mxu1 %vm634_vm1, %v1791_v49 }
 0x199   :  { %3646 = vmatpush3.bf16.msra.mxu1 %v3862_v52  ;;  %3653 = vmatprep.mubr.msk.bf16.mxu1 %vm3975_vm4, %v3974_v31 }
 0x19a   :  { %3647 = vmatprep.subr.bf16.mxu1 %v3974_v31 }
 0x19d   :  { %3648 = vmatpush3.bf16.msra.mxu1 %v3863_v53 }
 0x19e   :  { %3649 = vmatprep.subr.bf16.mxu1 %v3974_v31 }
 0x1a1   :  { %3650 = vmatpush3.bf16.msra.mxu1 %v3864_v54 }
 0x1a2   :  { %3651 = vmatprep.subr.bf16.mxu1 %v3974_v31 }
 0x1a5   :  { %3652 = vmatpush3.bf16.msra.mxu1 %v3865_v57 }
 0x1a6   :  { %3657 = vmatprep.subr.bf16.mxu1 %v3974_v31 }
 0x1dc   :  { %v3523_v55 = vpop.f32.mrf.mxu1 }
 0x1de   :  { %v675_v56 = vpop.f32.mrf.mxu1 }
 0x1e0   :  { %v3524_v58 = vpop.f32.mrf.mxu1 }
 0x1e2   :  { %v678_v60 = vpop.f32.mrf.mxu1 }
 0x1e4   :  { %v3531_v61 = vpop.f32.mrf.mxu1 }
 0x1e5   :  { %v750_v63 = vadd.f32 %v3531_v61, %v3523_v55 }
 0x1e6   :  { %v741_v0 = vpop.f32.mrf.mxu1 }
 0x1e7   :  { %v742_v2 = vadd.f32 %v741_v0, %v675_v56 }
 0x1e8   :  { %v3532_v3 = vpop.f32.mrf.mxu1 }
 0x1ea   :  { %v744_v4 = vpop.f32.mrf.mxu1 }
 0x1eb   :  { %v745_v5 = vadd.f32 %v744_v4, %v678_v60 }
 0x1ec   :  { %v3539_v6 = vpop.f32.mrf.mxu1 }
 0x1ed   :  { %v835_v7 = vadd.f32 %v3539_v6, %v750_v63 }
 0x1ee   :  { %v819_v8 = vpop.f32.mrf.mxu1 }
 0x1ef   :  { %v833_v9 = vadd.f32 %v819_v8, %v742_v2 }
 0x1f0   :  { %v3540_v10 = vpop.f32.mrf.mxu1 }
 0x1f2   :  { %v822_v11 = vpop.f32.mrf.mxu1 }
 0x1f3   :  { %v834_v12 = vadd.f32 %v822_v11, %v745_v5 }
 0x1f4   :  { %v3547_v13 = vpop.f32.mrf.mxu1 }
 0x1f5   :  { %v916_v14 = vadd.f32 %v3547_v13, %v835_v7 }
 0x1f6   :  { %v900_v15 = vpop.f32.mrf.mxu1 }
 0x1f7   :  { %v914_v16 = vadd.f32 %v900_v15, %v833_v9 }
 0x1f8   :  { %v3548_v17 = vpop.f32.mrf.mxu1 }
 0x1fa   :  { %v903_v18 = vpop.f32.mrf.mxu1 }
 0x1fb   :  { %v915_v19 = vadd.f32 %v903_v18, %v834_v12 }
 0x1fc   :  { %v3555_v20 = vpop.f32.mrf.mxu1 }
 0x1fd   :  { %v991_v21 = vadd.f32 %v3555_v20, %v916_v14 }
 0x1fe   :  { %v975_v22 = vpop.f32.mrf.mxu1 }
 0x1ff   :  { %v989_v23 = vadd.f32 %v975_v22, %v914_v16 }
 0x200   :  { %v3556_v24 = vpop.f32.mrf.mxu1 }
 0x202   :  { %v978_v25 = vpop.f32.mrf.mxu1 }
 0x203   :  { %v990_v26 = vadd.f32 %v978_v25, %v915_v19 }
 0x204   :  { %v3563_v27 = vpop.f32.mrf.mxu1 }
 0x205   :  { %v1071_v28 = vadd.f32 %v3563_v27, %v991_v21 }
 0x206   :  { %v1055_v29 = vpop.f32.mrf.mxu1 }
 0x207   :  { %v1069_v30 = vadd.f32 %v1055_v29, %v989_v23 }
 0x208   :  { %v3564_v32 = vpop.f32.mrf.mxu1 }
 0x20a   :  { %v1058_v33 = vpop.f32.mrf.mxu1 }
 0x20b   :  { %v1070_v34 = vadd.f32 %v1058_v33, %v990_v26 }
 0x20c   :  { %v3571_v35 = vpop.f32.mrf.mxu1 }
 0x20d   :  { %v1151_v36 = vadd.f32 %v3571_v35, %v1071_v28  ;;  %v4443_v35 = vld [vmem:[%s4761_s4] ss:$0 sm:$0xff]  ;;  %s3976_s4 = smov [#allocation2]  }
 0x20e   :  { %v1135_v37 = vpop.f32.mrf.mxu1  ;;  %s3141_s20 = sshll.u32 %s3976_s4, 4  ;;  %s3142_s20 = int_to_ptr.vmem [resolvable:$true] %s3141_s20 }
 0x20f   :  { %v1149_v7 = vadd.f32 %v1135_v37, %v1069_v30  ;;  %s3951_s1 = scalar_lea.vmem %s3142_s20, 32  ;;  %p3956_p1 = scmp.lt.s32.totalorder %s3142_s20, %s3142_s20 }
 0x210   :  { %v3572_v38 = vpop.f32.mrf.mxu1  ;;  %p3952_p0 = scmp.ne.s32.totalorder %s3142_s20, %s3951_s1  ;;  %p3957_p2 = scmp.lt.s32.totalorder %s3951_s1, %s3951_s1 }
 0x212   :  { %v1138_v39 = vpop.f32.mrf.mxu1  ;;  %p3958_p3 = por %p3957_p2, %p3956_p1 }
 0x213   :  { %v1150_v11 = vadd.f32 %v1138_v39, %v1070_v34 }
 0x214   :  { %v3579_v40 = vpop.f32.mrf.mxu1  ;;  %p3959_p4 = pnand %p3958_p3, %p3952_p0 }
 0x215   :  { %v1231_v41 = vadd.f32 %v3579_v40, %v1151_v36 }
 0x216   :  { %v1215_v42 = vpop.f32.mrf.mxu1 }
 0x217   :  { %v1229_v9 = vadd.f32 %v1215_v42, %v1149_v7  ;;  %v3883_v7 = vld [vmem:[%s4762_s5 + $0x78] sm:$0xff]  }
 0x218   :  { %v3580_v43 = vpop.f32.mrf.mxu1 }
 0x21a   :  { %v1218_v44 = vpop.f32.mrf.mxu1 }
 0x21b   :  { %v1230_v14 = vadd.f32 %v1218_v44, %v1150_v11  ;;  %v3867_v44 = vld [vmem:[%s4762_s5 + $0x18] sm:$0xff]   ;;  %v3885_v11 = vld [vmem:[%s4762_s5 + $0x68] sm:$0xff]  }
 0x21c   :  { %v3587_v45 = vpop.f32.mrf.mxu1 }
 0x21d   :  { %v1306_v46 = vadd.f32 %v3587_v45, %v1231_v41 }
 0x21e   :  { %v1290_v47 = vpop.f32.mrf.mxu1 }
 0x21f   :  { %v1304_v12 = vadd.f32 %v1290_v47, %v1229_v9  ;;  %v3868_v47 = vld [vmem:[%s4762_s5 + $0xd8] sm:$0xff]  }
 0x220   :  { %v3588_v48 = vpop.f32.mrf.mxu1 }
 0x222   :  { %v1293_v49 = vpop.f32.mrf.mxu1 }
 0x223   :  { %v1305_v17 = vadd.f32 %v1293_v49, %v1230_v14  ;;  %v3869_v49 = vld [vmem:[%s4762_s5 + $0x10] sm:$0xff]  }
 0x224   :  { %v3595_v62 = vpop.f32.mrf.mxu1 }
 0x225   :  { %v1386_v50 = vadd.f32 %v3595_v62, %v1306_v46  ;;  %v3870_v62 = vld [vmem:[%s4762_s5 + $0xd0] sm:$0xff]  }
 0x226   :  { %v1370_v51 = vpop.f32.mrf.mxu1 }
 0x227   :  { %v1384_v15 = vadd.f32 %v1370_v51, %v1304_v12  ;;  %v3872_v51 = vld [vmem:[%s4762_s5 + $0xc8] sm:$0xff]   ;;  %v3886_v12 = vld [vmem:[%s4762_s5 + $0x60] sm:$0xff]  }
 0x228   :  { %v3596_v52 = vpop.f32.mrf.mxu1 }
 0x229   :  { %v3873_v52 = vld [vmem:[%s4762_s5] sm:$0xff]  }
 0x22a   :  { %v1373_v53 = vpop.f32.mrf.mxu1 }
 0x22b   :  { %v1385_v20 = vadd.f32 %v1373_v53, %v1305_v17  ;;  %v3874_v53 = vld [vmem:[%s4762_s5 + $0xc0] sm:$0xff]  }
 0x22c   :  { %v3603_v54 = vpop.f32.mrf.mxu1  ;;  %v3890_v17 = vld [vmem:[%s4762_s5 + $0xa0] sm:$0xff]  }
 0x22d   :  { %v1466_v55 = vadd.f32 %v3603_v54, %v1386_v50  ;;  %v3871_v50 = vld [vmem:[%s4762_s5 + $0x8] sm:$0xff]   ;;  %v3875_v54 = vld [vmem:[%s4762_s5 + $0x58] sm:$0xff]  }
 0x22e   :  { %v1450_v56 = vpop.f32.mrf.mxu1 }
 0x22f   :  { %v1464_v18 = vadd.f32 %v1450_v56, %v1384_v15  ;;  %v3876_v56 = vld [vmem:[%s4762_s5 + $0x118] sm:$0xff]   ;;  %v3888_v15 = vld [vmem:[%s4762_s5 + $0xb0] sm:$0xff]  }
 0x230   :  { %v3604_v57 = vpop.f32.mrf.mxu1 }
 0x232   :  { %v1453_v58 = vpop.f32.mrf.mxu1 }
 0x233   :  { %v1465_v23 = vadd.f32 %v1453_v58, %v1385_v20  ;;  %v3892_v20 = vld [vmem:[%s4762_s5 + $0xf0] sm:$0xff]  }
 0x234   :  { %v3611_v59 = vpop.f32.mrf.mxu1 }
 0x235   :  { %v4432_v60 = vadd.f32 %v3611_v59, %v1466_v55  ;;  %v3877_v59 = vld [vmem:[%s4762_s5 + $0x50] sm:$0xff]  }
 0x236   :  { %v1530_v61 = vpop.f32.mrf.mxu1 }
 0x237   :  { %v1544_v21 = vadd.f32 %v1530_v61, %v1464_v18  ;;  %v3878_v61 = vld [vmem:[%s4762_s5 + $0x110] sm:$0xff]   ;;  %v3891_v18 = vld [vmem:[%s4762_s5 + $0xf8] sm:$0xff]  }
 0x238   :  { %v3612_v63 = vpop.f32.mrf.mxu1 }
 0x23a   :  { %v1533_v0 = vpop.f32.mrf.mxu1 }
 0x23b   :  { %v1545_v26 = vadd.f32 %v1533_v0, %v1465_v23  ;;  %v3879_v0 = vld [vmem:[%s4762_s5 + $0x48] sm:$0xff]  }
 0x23c   :  { %v4434_v2 = vpop.f32.mrf.mxu1 }
 0x23d   :  { %v1621_v55 = vadd.f32 %v4434_v2, %v4432_v60  ;;  %v3880_v2 = vld [vmem:[%s4762_s5 + $0x108] sm:$0xff]  }
 0x23e   :  { %v1605_v3 = vpop.f32.mrf.mxu1 }
 0x23f   :  { %v1619_v24 = vadd.f32 %v1605_v3, %v1544_v21  ;;  %v3893_v21 = vld [vmem:[%s4762_s5 + $0xe8] sm:$0xff]  }
 0x240   :  { %v3620_v4 = vpop.f32.mrf.mxu1 }
 0x241   :  { %v3881_v4 = vld [vmem:[%s4762_s5 + $0x40] sm:$0xff]  }
 0x242   :  { %v1608_v5 = vpop.f32.mrf.mxu1 }
 0x243   :  { %v1620_v29 = vadd.f32 %v1608_v5, %v1545_v26  ;;  %v3882_v5 = vld [vmem:[%s4762_s5 + $0x100] sm:$0xff]   ;;  %v3898_v26 = vld [vmem:[%s4764_s7 + $0x68] ss:$16 sps:$4 sm:$0xff]  }
 0x248   :  { %v4436_v6 = vpop.f32.mrf.mxu1 }
 0x249   :  { %v1701_v57 = vadd.f32 %v4436_v6, %v1621_v55 }
 0x24a   :  { %v1685_v8 = vpop.f32.mrf.mxu1 }
 0x24b   :  { %v1699_v27 = vadd.f32 %v1685_v8, %v1619_v24  ;;  %v3895_v24 = vld [vmem:[%s4764_s7 + $0x60] ss:$16 sps:$4 sm:$0xff]  }
 0x24c   :  { %v3628_v10 = vpop.f32.mrf.mxu1 }
 0x24d   :  { %v3884_v10 = vld [vmem:[%s4762_s5 + $0x70] sm:$0xff]  }
 0x24e   :  { %v1688_v13 = vpop.f32.mrf.mxu1 }
 0x24f   :  { %v1700_v33 = vadd.f32 %v1688_v13, %v1620_v29  ;;  %v3887_v13 = vld [vmem:[%s4762_s5 + $0xb8] sm:$0xff]  }
 0x250   :  { %v4438_v16 = vpop.f32.mrf.mxu1  ;;  %v3904_v29 = vld [vmem:[%s4764_s7 + $0x48] ss:$16 sps:$4 sm:$0xff]  }
 0x251   :  { %v1781_v60 = vadd.f32 %v4438_v16, %v1701_v57  ;;  %v3889_v16 = vld [vmem:[%s4762_s5 + $0xa8] sm:$0xff]  }
 0x252   :  { %v1765_v19 = vpop.f32.mrf.mxu1 }
 0x253   :  { %v1779_v30 = vadd.f32 %v1765_v19, %v1699_v27  ;;  %v3906_v27 = vld [vmem:[%s4764_s7 + $0x4c] ss:$16 sps:$4 sm:$0xff]  }
 0x254   :  { %v3636_v22 = vpop.f32.mrf.mxu1 }
 0x255   :  { %v3894_v22 = vld [vmem:[%s4762_s5 + $0xe0] sm:$0xff]  }
 0x256   :  { %v1768_v25 = vpop.f32.mrf.mxu1 }
 0x257   :  { %v1780_v37 = vadd.f32 %v1768_v25, %v1700_v33  ;;  %v3897_v25 = vld [vmem:[%s4764_s7 + $0x64] ss:$16 sps:$4 sm:$0xff]   ;;  %v3907_v33 = vld [vmem:[%s4764_s7 + $0x20] ss:$16 sps:$4 sm:$0xff]  }
 0x258   :  { %v3643_v28 = vpop.f32.mrf.mxu1 }
 0x259   :  { %v1861_v63 = vadd.f32 %v3643_v28, %v1781_v60  ;;  %v3901_v28 = vld [vmem:[%s4764_s7 + $0x40] ss:$16 sps:$4 sm:$0xff]  }
 0x25a   :  { %v1845_v32 = vpop.f32.mrf.mxu1 }
 0x25b   :  { %v1859_v34 = vadd.f32 %v1845_v32, %v1779_v30  ;;  %v1871_v3 = vadd.f32 %v4443_v35, %v1861_v63  ;;  %v3909_v30 = vld [vmem:[%s4764_s7 + $0x24] ss:$16 sps:$4 sm:$0xff]   ;;  %v3912_v32 = vld [vmem:[%s4764_s7 + $0x2c] ss:$16 sps:$4 sm:$0xff]  }
 0x25c   :  { %v3644_v36 = vpop.f32.mrf.mxu1 }
 0x25d   :  { %v1869_v38 = vadd.f32 %v4443_v35, %v1859_v34  ;;  %v1874_v6 = vmax.f32 %v1871_v3, 0.0  ;;  %v3910_v34 = vld [vmem:[%s4764_s7 + $0x28] ss:$16 sps:$4 sm:$0xff]   ;;  %v3918_v36 = vld [vmem:[%s4764_s7 + $0xc] ss:$16 sps:$4 sm:$0xff]  }
 0x25e   :  { %v1848_v39 = vpop.f32.mrf.mxu1 }
 0x25f   :  { %v1872_v40 = vmax.f32 %v1869_v38, 0.0  ;;  %v1860_v41 = vadd.f32 %v1848_v39, %v1780_v37  ;;  %v2492_v9 = vpack.c.bf16 %v1874_v6, %v1874_v6  ;;  %v3913_v37 = vld [vmem:[%s4764_s7] ss:$16 sps:$4 sm:$0xff]   ;;  %v3916_v38 = vld [vmem:[%s4764_s7 + $0x8] ss:$16 sps:$4 sm:$0xff]  }
 0x260   :  { %v3919_v39 = vld [vmem:[%s4766_s9 + $0x78] sm:$0xff]  }
 0x261   :  { %v4446_v42 = vpack.c.bf16 %v1872_v40, %v1872_v40  ;;  %v1870_v43 = vadd.f32 %v4443_v35, %v1860_v41  ;;  %v3915_v35 = vld [vmem:[%s4764_s7 + $0x4] ss:$16 sps:$4 sm:$0xff]   ;;  %v3920_v40 = vld [vmem:[%s4766_s9 + $0xf8] sm:$0xff]  }
 0x263   :  { %v1893_v45 = vrot.slane %v4446_v42, 1  ;;  %v1873_v46 = vmax.f32 %v1870_v43, 0.0  ;;  %v2037_v8 = vrot.slane %v4446_v42, 2  ;;  %v2114_v14 = vrot.slane %v4446_v42, 3 }
 0x265   :  { %v4456_v48 = vpack.c.bf16 %v1873_v46, %v1873_v46  ;;  %3654 = vmatmul.mubr.msk.bf16.vlgmr.msra.gmra.mxu1 %vm1918_vm5, %v1893_v45 }
 0x266   :  { %3658 = vmatpush3.bf16.msra.mxu1 %v3867_v44  ;;  %3665 = vmatprep.mubr.msk.bf16.mxu1 %vm3975_vm4, %v3974_v31 }
 0x267   :  { %3702 = vmatmul.mubr.msk.bf16.vlgmr.msra.gmra.mxu0 %vm1918_vm5, %v4456_v48  ;;  %3659 = vmatprep.subr.bf16.mxu1 %v3974_v31  ;;  %v2346_v58 = vrot.slane %v4456_v48, 2  ;;  %v2269_v19 = vrot.slane %v4456_v48, 1  ;;  %v2423_v23 = vrot.slane %v4456_v48, 3 }
 0x268   :  { %3718 = vmatpush3.bf16.msra.mxu0 %v3868_v47  ;;  %3725 = vmatprep.mubr.msk.bf16.mxu0 %vm3975_vm4, %v3974_v31 }
 0x269   :  { %3719 = vmatprep.subr.bf16.mxu0 %v3974_v31 }
 0x26a   :  { %3660 = vmatpush3.bf16.msra.mxu1 %v3869_v49 }
 0x26b   :  { %3661 = vmatprep.subr.bf16.mxu1 %v3974_v31 }
 0x26c   :  { %3720 = vmatpush3.bf16.msra.mxu0 %v3870_v62 }
 0x26d   :  { %3721 = vmatprep.subr.bf16.mxu0 %v3974_v31 }
 0x26e   :  { %3662 = vmatpush3.bf16.msra.mxu1 %v3871_v50 }
 0x26f   :  { %3663 = vmatprep.subr.bf16.mxu1 %v3974_v31 }
 0x270   :  { %3722 = vmatpush3.bf16.msra.mxu0 %v3872_v51 }
 0x271   :  { %3723 = vmatprep.subr.bf16.mxu0 %v3974_v31 }
 0x272   :  { %3664 = vmatpush3.bf16.msra.mxu1 %v3873_v52 }
 0x273   :  { %3669 = vmatprep.subr.bf16.mxu1 %v3974_v31 }
 0x274   :  { %3724 = vmatpush3.bf16.msra.mxu0 %v3874_v53 }
 0x275   :  { %3666 = vmatmul.mubr.msk.bf16.vlgmr.msra.gmra.mxu1 %vm1918_vm5, %v4446_v42  ;;  %3741 = vmatprep.subr.bf16.mxu0 %v3974_v31 }
 0x276   :  { %3670 = vmatpush3.bf16.msra.mxu1 %v3875_v54  ;;  %3677 = vmatprep.mubr.msk.bf16.mxu1 %vm3975_vm4, %v3974_v31 }
 0x277   :  { %3726 = vmatmul.mubr.msk.bf16.vlgmr.msra.gmra.mxu0 %vm1918_vm5, %v2346_v58  ;;  %3671 = vmatprep.subr.bf16.mxu1 %v3974_v31 }
 0x278   :  { %3742 = vmatpush3.bf16.msra.mxu0 %v3876_v56  ;;  %3749 = vmatprep.mubr.msk.bf16.mxu0 %vm3975_vm4, %v3974_v31 }
 0x279   :  { %3743 = vmatprep.subr.bf16.mxu0 %v3974_v31 }
 0x27a   :  { %3672 = vmatpush3.bf16.msra.mxu1 %v3877_v59 }
 0x27b   :  { %3673 = vmatprep.subr.bf16.mxu1 %v3974_v31 }
 0x27c   :  { %3744 = vmatpush3.bf16.msra.mxu0 %v3878_v61 }
 0x27d   :  { %3745 = vmatprep.subr.bf16.mxu0 %v3974_v31 }
 0x27e   :  { %3674 = vmatpush3.bf16.msra.mxu1 %v3879_v0 }
 0x27f   :  { %3675 = vmatprep.subr.bf16.mxu1 %v3974_v31 }
 0x280   :  { %3746 = vmatpush3.bf16.msra.mxu0 %v3880_v2 }
 0x281   :  { %3747 = vmatprep.subr.bf16.mxu0 %v3974_v31 }
 0x282   :  { %3676 = vmatpush3.bf16.msra.mxu1 %v3881_v4 }
 0x283   :  { %3681 = vmatprep.subr.bf16.mxu1 %v3974_v31 }
 0x284   :  { %3748 = vmatpush3.bf16.msra.mxu0 %v3882_v5 }
 0x285   :  { %3678 = vmatmul.mubr.msk.bf16.vlgmr.msra.gmra.mxu1 %vm1918_vm5, %v2037_v8 }
 0x286   :  { %3682 = vmatpush3.bf16.msra.mxu1 %v3883_v7  ;;  %3689 = vmatprep.mubr.msk.bf16.mxu1 %vm3975_vm4, %v3974_v31 }
 0x287   :  { %3750 = vmatmul.mubr.msk.bf16.vlgmr.msra.gmra.mxu0 %vm1918_vm5, %v2492_v9  ;;  %3683 = vmatprep.subr.bf16.mxu1 %v3974_v31 }
 0x288   :  { %2773 = vmatprep.mubr.bf16.mxu0 %v3973_v1 }
 0x28a   :  { %3684 = vmatpush3.bf16.msra.mxu1 %v3884_v10 }
 0x28b   :  { %3685 = vmatprep.subr.bf16.mxu1 %v3974_v31 }
 0x28e   :  { %3686 = vmatpush3.bf16.msra.mxu1 %v3885_v11 }
 0x28f   :  { %3687 = vmatprep.subr.bf16.mxu1 %v3974_v31 }
 0x292   :  { %3688 = vmatpush3.bf16.msra.mxu1 %v3886_v12 }
 0x293   :  { %3705 = vmatprep.subr.bf16.mxu1 %v3974_v31 }
 0x295   :  { %3690 = vmatmul.mubr.msk.bf16.vlgmr.msra.gmra.mxu1 %vm1918_vm5, %v2114_v14 }
 0x296   :  { %3706 = vmatpush3.bf16.msra.mxu1 %v3887_v13  ;;  %3713 = vmatprep.mubr.msk.bf16.mxu1 %vm3975_vm4, %v3974_v31 }
 0x297   :  { %3707 = vmatprep.subr.bf16.mxu1 %v3974_v31 }
 0x29a   :  { %3708 = vmatpush3.bf16.msra.mxu1 %v3888_v15 }
 0x29b   :  { %3709 = vmatprep.subr.bf16.mxu1 %v3974_v31 }
 0x29e   :  { %3710 = vmatpush3.bf16.msra.mxu1 %v3889_v16 }
 0x29f   :  { %3711 = vmatprep.subr.bf16.mxu1 %v3974_v31 }
 0x2a2   :  { %3712 = vmatpush3.bf16.msra.mxu1 %v3890_v17 }
 0x2a3   :  { %3729 = vmatprep.subr.bf16.mxu1 %v3974_v31 }
 0x2a5   :  { %3714 = vmatmul.mubr.msk.bf16.vlgmr.msra.gmra.mxu1 %vm1918_vm5, %v2269_v19 }
 0x2a6   :  { %3730 = vmatpush3.bf16.msra.mxu1 %v3891_v18  ;;  %3737 = vmatprep.mubr.msk.bf16.mxu1 %vm3975_vm4, %v3974_v31  ;;  %v3312_v18 = vld [vmem:[%s4763_s6] ss:$0 sm:$0xff] }
 0x2a7   :  { %3731 = vmatprep.subr.bf16.mxu1 %v3974_v31 }
 0x2aa   :  { %3732 = vmatpush3.bf16.msra.mxu1 %v3892_v20 }
 0x2ab   :  { %3733 = vmatprep.subr.bf16.mxu1 %v3974_v31 }
 0x2ae   :  { %3734 = vmatpush3.bf16.msra.mxu1 %v3893_v21 }
 0x2af   :  { %3735 = vmatprep.subr.bf16.mxu1 %v3974_v31  ;;  %v3900_v31 = vld [vmem:[%s4764_s7 + $0x6c] ss:$16 sps:$4 sm:$0xff]  }
 0x2b0   :  { %2749 = vmatprep.subr.bf16.mxu0 %v3900_v31 }
 0x2b1   :  { %2750 = vmatpush1.bf16.msra.mxu0 %v3898_v26  ;;  %v3922_v26 = vld [vmem:[%s4766_s9 + $0xb8] sm:$0xff]  }
 0x2b2   :  { %3736 = vmatpush3.bf16.msra.mxu1 %v3894_v22  ;;  %2751 = vmatprep.subr.bf16.mxu0 %v3906_v27  ;;  %v3924_v27 = vld [vmem:[%s4766_s9 + $0xf0] sm:$0xff]  }
 0x2b3   :  { %2708 = vmatprep.subr.bf16.mxu1 %v3897_v25  ;;  %v3921_v25 = vld [vmem:[%s4766_s9 + $0x38] sm:$0xff]  }
 0x2b5   :  { %3738 = vmatmul.mubr.msk.bf16.vlgmr.msra.gmra.mxu1 %vm1918_vm5, %v2423_v23  ;;  %2752 = vmatpush1.bf16.msra.mxu0 %v3904_v29  ;;  %v3926_v29 = vld [vmem:[%s4766_s9 + $0xb0] sm:$0xff]  }
 0x2b6   :  { %2732 = vmatprep.mubr.bf16.mxu1 %v3973_v1  ;;  %v3903_v1 = vld [vmem:[%s4764_s7 + $0x44] ss:$16 sps:$4 sm:$0xff]   ;;  %2709 = vmatpush1.bf16.msra.mxu1 %v3895_v24 }
 0x2b7   :  { %2710 = vmatprep.subr.bf16.mxu1 %v3903_v1  ;;  %2753 = vmatprep.subr.bf16.mxu0 %v3912_v32  ;;  %v3923_v1 = vld [vmem:[%s4766_s9 + $0x70] sm:$0xff]   ;;  %v3928_v32 = vld [vmem:[%s4766_s9 + $0xe8] sm:$0xff]  }
 0x2b9   :  { %2754 = vmatpush1.bf16.msra.mxu0 %v3910_v34  ;;  %v3930_v34 = vld [vmem:[%s4766_s9 + $0xa8] sm:$0xff]  }
 0x2ba   :  { %2711 = vmatpush1.bf16.msra.mxu1 %v3901_v28  ;;  %2755 = vmatprep.subr.bf16.mxu0 %v3918_v36  ;;  %v3925_v28 = vld [vmem:[%s4766_s9 + $0x30] sm:$0xff]   ;;  %v3932_v36 = vld [vmem:[%s4766_s9 + $0xe0] sm:$0xff]  }
 0x2bb   :  { %2712 = vmatprep.subr.bf16.mxu1 %v3909_v30  ;;  %v3927_v30 = vld [vmem:[%s4766_s9 + $0x68] sm:$0xff]  }
 0x2bd   :  { %2756 = vmatpush1.bf16.msra.mxu0 %v3916_v38  ;;  %v3934_v38 = vld [vmem:[%s4766_s9 + $0xa0] sm:$0xff]  }
 0x2be   :  { %2713 = vmatpush1.bf16.msra.mxu1 %v3907_v33  ;;  %3495 = vmatprep.subr.bf16.mxu0 %v3920_v40  ;;  %v3929_v33 = vld [vmem:[%s4766_s9 + $0x28] sm:$0xff]   ;;  %v3936_v40 = vld [vmem:[%s4766_s9 + $0xd8] sm:$0xff]  }
 0x2bf   :  { %2714 = vmatprep.subr.bf16.mxu1 %v3915_v35  ;;  %v3931_v35 = vld [vmem:[%s4766_s9 + $0x60] sm:$0xff]  }
 0x2c2   :  { %2715 = vmatpush1.bf16.msra.mxu1 %v3913_v37  ;;  %v3933_v37 = vld [vmem:[%s4766_s9 + $0x20] sm:$0xff]  }
 0x2c3   :  { %3473 = vmatprep.subr.bf16.mxu1 %v3919_v39  ;;  %v3935_v39 = vld [vmem:[%s4766_s9 + $0x58] sm:$0xff]  }
 0x325   :  { %v1956_v41 = vpop.f32.mrf.mxu1 }
 0x327   :  { %v3655_v42 = vpop.f32.mrf.mxu1  ;;  %v2253_v43 = vpop.f32.mrf.mxu0 }
 0x328   :  { %v3938_v42 = vld [vmem:[%s4766_s9 + $0x98] sm:$0xff]  }
 0x329   :  { %v1959_v44 = vpop.f32.mrf.mxu1  ;;  %v3703_v45 = vpop.f32.mrf.mxu0 }
 0x32a   :  { %v3940_v44 = vld [vmem:[%s4766_s9 + $0xd0] sm:$0xff]  }
 0x32b   :  { %v3656_v46 = vpop.f32.mrf.mxu1  ;;  %v2256_v47 = vpop.f32.mrf.mxu0  ;;  %v3941_v45 = vld [vmem:[%s4766_s9 + $0x10] sm:$0xff]  }
 0x32c   :  { %v3942_v46 = vld [vmem:[%s4766_s9 + $0x90] sm:$0xff]   ;;  %v3943_v47 = vld [vmem:[%s4766_s9 + $0x48] sm:$0xff]  }
 0x32d   :  { %v3704_v48 = vpop.f32.mrf.mxu0 }
 0x32e   :  { %v3944_v48 = vld [vmem:[%s4766_s9 + $0xc8] sm:$0xff]  }
 0x335   :  { %v2023_v49 = vpop.f32.mrf.mxu1 }
 0x336   :  { %v2024_v2 = vadd.f32 %v2023_v49, %v1956_v41  ;;  %v3937_v41 = vld [vmem:[%s4766_s9 + $0x18] sm:$0xff]   ;;  %v3945_v49 = vld [vmem:[%s4766_s9 + $0x8] sm:$0xff]  }
 0x337   :  { %v3667_v62 = vpop.f32.mrf.mxu1  ;;  %v2408_v50 = vpop.f32.mrf.mxu0 }
 0x338   :  { %v3946_v62 = vld [vmem:[%s4766_s9 + $0x88] sm:$0xff]  }
 0x339   :  { %v2026_v51 = vpop.f32.mrf.mxu1  ;;  %v3727_v52 = vpop.f32.mrf.mxu0 }
 0x33a   :  { %v3948_v51 = vld [vmem:[%s4766_s9 + $0xc0] sm:$0xff]  }
 0x33b   :  { %v3668_v53 = vpop.f32.mrf.mxu1  ;;  %v2411_v54 = vpop.f32.mrf.mxu0  ;;  %v3949_v52 = vld [vmem:[%s4766_s9] sm:$0xff]  }
 0x33c   :  { %v3950_v53 = vld [vmem:[%s4766_s9 + $0x80] sm:$0xff]   ;;  %v2597_v54 = vlaneseq }
 0x33d   :  { %v3728_v55 = vpop.f32.mrf.mxu0 }
 0x33e   :  { %v2598_v55 = vshrl.u32 %v2597_v54, 7 }
 0x345   :  { %v2099_v56 = vpop.f32.mrf.mxu1 }
 0x346   :  { %v2105_v3 = vadd.f32 %v2099_v56, %v2024_v2  ;;  %v2599_v56 = vsub.s32 0, %v2598_v55 }
 0x347   :  { %v3679_v57 = vpop.f32.mrf.mxu1  ;;  %v2562_v58 = vpop.f32.mrf.mxu0 }
 0x348   :  { %v2607_v57 = vsub.s32 2, %v2598_v55 }
 0x349   :  { %v2102_v59 = vpop.f32.mrf.mxu1  ;;  %v3751_v60 = vpop.f32.mrf.mxu0 }
 0x34a   :  { %v2603_v59 = vsub.s32 1, %v2598_v55  ;;  %v2611_v60 = vsub.s32 3, %v2598_v55 }
 0x34b   :  { %v3680_v61 = vpop.f32.mrf.mxu1  ;;  %v2565_v63 = vpop.f32.mrf.mxu0 }
 0x34d   :  { %v3752_v0 = vpop.f32.mrf.mxu0 }
 0x355   :  { %v2176_v4 = vpop.f32.mrf.mxu1 }
 0x356   :  { %v2182_v5 = vadd.f32 %v2176_v4, %v2105_v3 }
 0x357   :  { %v3691_v6 = vpop.f32.mrf.mxu1 }
 0x358   :  { %v2259_v7 = vadd.f32 %v2253_v43, %v2182_v5  ;;  %v3939_v43 = vld [vmem:[%s4766_s9 + $0x50] sm:$0xff]  }
 0x359   :  { %v2179_v8 = vpop.f32.mrf.mxu1 }
 0x35b   :  { %v3692_v9 = vpop.f32.mrf.mxu1 }
 0x365   :  { %v2331_v10 = vpop.f32.mrf.mxu1 }
 0x366   :  { %v2337_v14 = vadd.f32 %v2331_v10, %v2259_v7 }
 0x367   :  { %v3715_v11 = vpop.f32.mrf.mxu1 }
 0x368   :  { %v2414_v15 = vadd.f32 %v2408_v50, %v2337_v14  ;;  %v3947_v50 = vld [vmem:[%s4766_s9 + $0x40] sm:$0xff]  }
 0x369   :  { %v2334_v12 = vpop.f32.mrf.mxu1 }
 0x36b   :  { %v3716_v13 = vpop.f32.mrf.mxu1 }
 0x375   :  { %v2485_v16 = vpop.f32.mrf.mxu1 }
 0x376   :  { %v2491_v17 = vadd.f32 %v2485_v16, %v2414_v15 }
 0x377   :  { %v3739_v19 = vpop.f32.mrf.mxu1 }
 0x378   :  { %v2568_v20 = vadd.f32 %v2562_v58, %v2491_v17  ;;  %v2595_v58 = vld [vmem:[%s4765_s8] sm:$0xf] }
 0x379   :  { %v2488_v21 = vpop.f32.mrf.mxu1  ;;  %v2600_v61 = vrot.slane %v2595_v58, %v2599_v56  ;;  %v2608_v63 = vrot.slane %v2595_v58, %v2607_v57  ;;  %v2604_v0 = vrot.slane %v2595_v58, %v2603_v59  ;;  %v2612_v2 = vrot.slane %v2595_v58, %v2611_v60 }
 0x37a   :  { %v2576_v22 = vadd.f32 %v3312_v18, %v2568_v20 }
 0x37b   :  { %v3740_v23 = vpop.f32.mrf.mxu1 }
 0x37c   :  { %v2577_v24 = vmax.f32 %v2576_v22, 0.0 }
 0x37e   :  { %v2578_v31 = vpack.c.bf16 %v2577_v24, %v2577_v24 }
 0x380   :  { %3329 = vmatmul.mubr.msk.bf16.vlgmr.msra.gmra.mxu1 %vm1918_vm5, %v2578_v31  ;;  %3330 = vmatmul.mubr.msk.bf16.vlgmr.msra.gmra.mxu0 %vm1918_vm5, %v2578_v31 }
 0x381   :  { %3474 = vmatpush3.bf16.msra.mxu1 %v3921_v25  ;;  %3496 = vmatpush3.bf16.msra.mxu0 %v3922_v26  ;;  %v3331_v25 = vld [vmem:[%s4767_s10] ss:$0 sm:$0xff] }
 0x382   :  { %3475 = vmatprep.subr.bf16.mxu1 %v3923_v1  ;;  %3497 = vmatprep.subr.bf16.mxu0 %v3924_v27 }
 0x385   :  { %3476 = vmatpush3.bf16.msra.mxu1 %v3925_v28  ;;  %3498 = vmatpush3.bf16.msra.mxu0 %v3926_v29 }
 0x386   :  { %3477 = vmatprep.subr.bf16.mxu1 %v3927_v30  ;;  %3499 = vmatprep.subr.bf16.mxu0 %v3928_v32 }
 0x389   :  { %3478 = vmatpush3.bf16.msra.mxu1 %v3929_v33  ;;  %3500 = vmatpush3.bf16.msra.mxu0 %v3930_v34 }
 0x38a   :  { %3479 = vmatprep.subr.bf16.mxu1 %v3931_v35  ;;  %3501 = vmatprep.subr.bf16.mxu0 %v3932_v36 }
 0x38d   :  { %3480 = vmatpush3.bf16.msra.mxu1 %v3933_v37  ;;  %3502 = vmatpush3.bf16.msra.mxu0 %v3934_v38 }
 0x38e   :  { %3481 = vmatprep.subr.bf16.mxu1 %v3935_v39  ;;  %3503 = vmatprep.subr.bf16.mxu0 %v3936_v40 }
 0x391   :  { %3482 = vmatpush3.bf16.msra.mxu1 %v3937_v41  ;;  %3504 = vmatpush3.bf16.msra.mxu0 %v3938_v42 }
 0x392   :  { %3483 = vmatprep.subr.bf16.mxu1 %v3939_v43  ;;  %3505 = vmatprep.subr.bf16.mxu0 %v3940_v44 }
 0x395   :  { %3484 = vmatpush3.bf16.msra.mxu1 %v3941_v45  ;;  %3506 = vmatpush3.bf16.msra.mxu0 %v3942_v46 }
 0x396   :  { %3485 = vmatprep.subr.bf16.mxu1 %v3943_v47  ;;  %3507 = vmatprep.subr.bf16.mxu0 %v3944_v48 }
 0x399   :  { %3486 = vmatpush3.bf16.msra.mxu1 %v3945_v49  ;;  %3508 = vmatpush3.bf16.msra.mxu0 %v3946_v62 }
 0x39a   :  { %3487 = vmatprep.subr.bf16.mxu1 %v3947_v50  ;;  %3509 = vmatprep.subr.bf16.mxu0 %v3948_v51 }
 0x39d   :  { %3488 = vmatpush3.bf16.msra.mxu1 %v3949_v52  ;;  %3510 = vmatpush3.bf16.msra.mxu0 %v3950_v53 }
 0x440   :  { %v2734_v3 = vpop.f32.mrf.mxu1  ;;  %v2775_v4 = vpop.f32.mrf.mxu0 }
 0x441   :  { %v2735_v5 = vadd.f32 %v2734_v3, %v2600_v61  ;;  %v2776_v6 = vadd.f32 %v2775_v4, %v2608_v63 }
 0x442   :  { %v2736_v7 = vpop.f32.mrf.mxu1  ;;  %v2777_v8 = vpop.f32.mrf.mxu0 }
 0x443   :  { %v2737_v9 = vadd.f32 %v2736_v7, %v2604_v0  ;;  %v2778_v10 = vadd.f32 %v2777_v8, %v2612_v2  ;;  %v2782_v11 = vmax.f32 %v2735_v5, 0.0  ;;  %v2784_v12 = vmax.f32 %v2776_v6, 0.0 }
 0x444   :  { %v2738_v13 = vpop.f32.mrf.mxu1  ;;  %v2779_v14 = vpop.f32.mrf.mxu0 }
 0x445   :  { %v2783_v15 = vmax.f32 %v2737_v9, 0.0  ;;  %v2785_v16 = vmax.f32 %v2778_v10, 0.0  ;;  %v2786_v21 = vpack.c.bf16 %v2782_v11, %v2782_v11  ;;  %v2788_v22 = vpack.c.bf16 %v2784_v12, %v2784_v12 }
 0x446   :  { %v2739_v17 = vpop.f32.mrf.mxu1  ;;  %v2780_v18 = vpop.f32.mrf.mxu0 }
 0x447   :  { %v2787_v19 = vpack.c.bf16 %v2783_v15, %v2783_v15  ;;  %v2789_v20 = vpack.c.bf16 %v2785_v16, %v2785_v16 }
 0x449   :  { %3085 = vmatprep.mubr.bf16.mxu1 %v2787_v19  ;;  %3125 = vmatprep.mubr.bf16.mxu0 %v2789_v20 }
 0x44a   :  { %3086 = vmatmul.mubr.bf16.vlgmr.msra.gmra.mxu1 %v2786_v21  ;;  %3126 = vmatmul.mubr.bf16.vlgmr.msra.gmra.mxu0 %v2788_v22 }
 0x50a   :  { %v3489_v23 = vpop.f32.mrf.mxu1  ;;  %v3511_v24 = vpop.f32.mrf.mxu0 }
 0x50c   :  { %v3490_v26 = vpop.f32.mrf.mxu1  ;;  %v3512_v31 = vpop.f32.mrf.mxu0 }
 0x50d   :  { %v3491_v1 = vadd.f32 %v3490_v26, %v3489_v23  ;;  %v3513_v30 = vadd.f32 %v3512_v31, %v3511_v24 }
 0x50e   :  { %v3492_v27 = vpop.f32.mrf.mxu1  ;;  %v3514_v28 = vpop.f32.mrf.mxu0 }
 0x50f   :  { %v3088_v29 = vadd.f32 %v3491_v1, %v3331_v25 }
 0x510   :  { %v3493_v32 = vpop.f32.mrf.mxu1  ;;  %v3515_v33 = vpop.f32.mrf.mxu0 }
 0x511   :  { %v3128_v34 = vadd.f32 %v3513_v30, %v3088_v29 }
 0x513   :  { %3134 = vst.msk [vmem:[#allocation2] sm:$0x3] %vm3133_vm6, %v3128_v34 }
 0x514   :  { %3962 = shalt.err (!%p3959_p4)
}
 0x515   :  { %3144 = dma.vmem_to_hbm [thread:$0]  %s3142_s20, 32, %s4768_s11, [#allocation3]  }
 0x516   :  { %3971 = dma.done.wait [#allocation3], 32  }
 0x517   :  { %3972 = vsyncadd [#allocation3], 4294967264 }
 0x518   :  { %3148 = vsyncpa [#allocation3], 1 }

</bundles_post_ra>
